<compile_context>
chip_gen: v7x
topology: tpu7x:2x2x1
jax: 0.10.0
libtpu: 0.0.40
codegen_flags: <defaults>
</compile_context>

<pallas_src>
import functools

import jax
import jax.numpy as jnp
from jax.experimental import pallas as pl
from jax.experimental.pallas import tpu as pltpu


# --------------------------- fused LSTM + FC kernel ---------------------------
def _lstm_fused_kernel(*args, num_layers, hidden_size, T, Bp):
    """args = (x_tm, [w_ih_t, w_hh_t, bias] * L, w_fc_t, b_fc, out, gates_sc).

    Weight gate columns are pre-permuted to [i, f, o, g].
    """
    H = hidden_size
    L = num_layers
    n_w = 3 * L
    x_ref = args[0]
    w_refs = args[1:1 + n_w]
    w_fc_ref = args[1 + n_w]
    b_fc_ref = args[2 + n_w]
    out_ref = args[3 + n_w]
    gates_sc = args[4 + n_w]

    # Hoisted weight loads (small, reused every step).
    whh = [w_refs[3 * l + 1][...] for l in range(L)]                 # (H, 4H)
    wih = [None] + [w_refs[3 * l + 0][...] for l in range(1, L)]     # (H, 4H)
    bias = [None] + [w_refs[3 * l + 2][...] for l in range(1, L)]    # (1, 4H)

    # Layer-0 input projection for ALL timesteps in one batched matmul:
    # (T*Bp, D_in) @ (D_in, 4H).  Off the serial critical path.
    gates_sc[...] = (
        jnp.dot(x_ref[...], w_refs[0][...], preferred_element_type=jnp.float32)
        + w_refs[2][...])

    zeros = jnp.zeros((Bp, H), jnp.float32)
    h = [zeros] * L
    c = [zeros] * L

    def cell(l, g_pre, h_l, c_l):
        g = g_pre + jnp.dot(h_l, whh[l], preferred_element_type=jnp.float32)
        # Gate order [i, f, o, g]: one full-vreg sigmoid + one narrow tanh.
        s = jax.nn.sigmoid(g)
        g_g = jnp.tanh(g[:, 3 * H:4 * H])
        c_n = s[:, H:2 * H] * c_l + s[:, 0:H] * g_g
        h_n = s[:, 2 * H:3 * H] * jnp.tanh(c_n)
        return h_n, c_n

    # Wavefront over anti-diagonals w = l + t.  Cells in a wavefront are
    # independent; process layers top-down so layer l+1 consumes h[l] from
    # the PREVIOUS wavefront before layer l overwrites it this wavefront.
    for w in range(T + L - 1):
        for l in range(min(L - 1, w), -1, -1):
            t = w - l
            if t < 0 or t >= T:
                continue
            if l == 0:
                g_pre = gates_sc[t * Bp:(t + 1) * Bp, :]
            else:
                g_pre = bias[l] + jnp.dot(
                    h[l - 1], wih[l], preferred_element_type=jnp.float32)
            h[l], c[l] = cell(l, g_pre, h[l], c[l])

    # Final FC on each layer's last hidden state (PyTorch h_out, layer-major).
    # Output is lane-padded to Cp=128 -> full unmasked vreg stores.
    w_fc = w_fc_ref[...]
    b_fc = b_fc_ref[...]
    for l in range(L):
        out_ref[l * Bp:(l + 1) * Bp, :] = (
            jnp.dot(h[l], w_fc, preferred_element_type=jnp.float32) + b_fc
        ).astype(out_ref.dtype)


def lstm_forecaster(x, params, hidden_size, num_layers, num_classes):
    """x: (B, T, input_size) -> out: (num_layers * B, num_classes)

    Reproduces: _, (h_out, _) = lstm(x, (0, 0)); out = fc(h_out.view(-1, H))
    """
    B, T, D_in = x.shape
    H = hidden_size
    C = num_classes
    Bp = ((B + 7) // 8) * 8                     # pad batch to sublane multiple
    Cp = ((C + 127) // 128) * 128               # lane-dense FC output

    # Time-major, batch-padded, flattened input: (T*Bp, D_in).  Padding rows
    # are zeros and are dropped after the kernel.
    x_t = jnp.transpose(x.astype(jnp.float32), (1, 0, 2))        # (T, B, D)
    x_tm = jnp.pad(x_t, ((0, 0), (0, Bp - B), (0, 0))).reshape(T * Bp, D_in)

    def reorder_cols(w_t):
        # PyTorch gate order along 4H is [i|f|g|o]; permute to [i|f|o|g].
        return jnp.concatenate(
            [w_t[..., :2 * H], w_t[..., 3 * H:4 * H], w_t[..., 2 * H:3 * H]],
            axis=-1)

    flat_w = []
    in_specs = [pl.BlockSpec((T * Bp, D_in), lambda i: (0, 0))]
    for l in range(num_layers):
        p = params["lstm"][l]
        d_in = D_in if l == 0 else H
        flat_w += [
            reorder_cols(jnp.transpose(p["w_ih"])),                  # (d_in,4H)
            reorder_cols(jnp.transpose(p["w_hh"])),                  # (H, 4H)
            reorder_cols((p["b_ih"] + p["b_hh"]).reshape(1, 4 * H)),  # (1, 4H)
        ]
        in_specs += [
            pl.BlockSpec((d_in, 4 * H), lambda i: (0, 0)),
            pl.BlockSpec((H, 4 * H), lambda i: (0, 0)),
            pl.BlockSpec((1, 4 * H), lambda i: (0, 0)),
        ]

    # FC weights/bias, lane-padded to Cp.
    w_fc_p = jnp.zeros((H, Cp), jnp.float32).at[:, :C].set(
        jnp.transpose(params["fc"]["w"]))
    b_fc_p = jnp.zeros((1, Cp), jnp.float32).at[:, :C].set(
        params["fc"]["b"].reshape(1, C))
    flat_w += [w_fc_p, b_fc_p]
    in_specs += [pl.BlockSpec((H, Cp), lambda i: (0, 0)),
                 pl.BlockSpec((1, Cp), lambda i: (0, 0))]

    kernel = functools.partial(_lstm_fused_kernel, num_layers=num_layers,
                               hidden_size=H, T=T, Bp=Bp)

    out_padded = pl.pallas_call(
        kernel,
        out_shape=jax.ShapeDtypeStruct((num_layers * Bp, Cp), jnp.float32),
        grid=(1,),
        in_specs=in_specs,
        out_specs=pl.BlockSpec((num_layers * Bp, Cp), lambda i: (0, 0)),
        scratch_shapes=[
            pltpu.VMEM((T * Bp, 4 * H), jnp.float32),   # layer-0 all-step gates
        ],
        compiler_params=pltpu.CompilerParams(
            dimension_semantics=("arbitrary",)),
    )(x_tm, *flat_w)

    # Strip batch/lane padding, keeping PyTorch's layer-major h_out ordering.
    return out_padded.reshape(num_layers, Bp, Cp)[:, :B, :C].reshape(
        num_layers * B, C)


# ------------------------------- parameters ----------------------------------
def init_params(key, num_classes, input_size, hidden_size, num_layers):
    """Deterministic init mirroring PyTorch shapes (uniform(-k, k), k=1/sqrt(H))."""
    k = 1.0 / jnp.sqrt(jnp.float32(hidden_size))
    params = {"lstm": [], "fc": None}
    for layer in range(num_layers):
        d_in = input_size if layer == 0 else hidden_size
        key, k1, k2, k3, k4 = jax.random.split(key, 5)
        params["lstm"].append(dict(
            w_ih=jax.random.uniform(k1, (4 * hidden_size, d_in), jnp.float32, -k, k),
            w_hh=jax.random.uniform(k2, (4 * hidden_size, hidden_size), jnp.float32, -k, k),
            b_ih=jax.random.uniform(k3, (4 * hidden_size,), jnp.float32, -k, k),
            b_hh=jax.random.uniform(k4, (4 * hidden_size,), jnp.float32, -k, k),
        ))
    key, k1, k2 = jax.random.split(key, 3)
    params["fc"] = dict(
        w=jax.random.uniform(k1, (num_classes, hidden_size), jnp.float32, -k, k),
        b=jax.random.uniform(k2, (num_classes,), jnp.float32, -k, k),
    )
    return params


# ------------------------------ Reference (JAX) -------------------------------
def _reference(x, params, hidden_size, num_layers):
    B = x.shape[0]
    inp = jnp.transpose(x, (1, 0, 2)).astype(jnp.float32)
    h_finals = []
    for layer in range(num_layers):
        p = params["lstm"][layer]
        w_ih_t = p["w_ih"].T
        w_hh_t = p["w_hh"].T
        b = p["b_ih"] + p["b_hh"]
        h = jnp.zeros((B, hidden_size), jnp.float32)
        c = jnp.zeros((B, hidden_size), jnp.float32)
        outs = []
        for t in range(inp.shape[0]):
            g = inp[t] @ w_ih_t + h @ w_hh_t + b
            H = hidden_size
            i = jax.nn.sigmoid(g[:, :H]); f = jax.nn.sigmoid(g[:, H:2 * H])
            gg = jnp.tanh(g[:, 2 * H:3 * H]); o = jax.nn.sigmoid(g[:, 3 * H:])
            c = f * c + i * gg
            h = o * jnp.tanh(c)
            outs.append(h)
        inp = jnp.stack(outs, 0)
        h_finals.append(h)
    h_out = jnp.concatenate(h_finals, 0)
    return h_out @ params["fc"]["w"].T + params["fc"]["b"]


if __name__ == "__main__":
    num_classes, input_size, hidden_size, num_layers = 3, 4, 32, 2
    B, T = 2, 8

    key = jax.random.PRNGKey(0)
    key, xk = jax.random.split(key)
    x = jax.random.normal(xk, (B, T, input_size), jnp.float32)
    params = init_params(key, num_classes, input_size, hidden_size, num_layers)

    out = lstm_forecaster(x, params, hidden_size, num_layers, num_classes)
    out = jax.block_until_ready(out)

    ref = _reference(x, params, hidden_size, num_layers)
    assert out.shape == (num_layers * B, num_classes), out.shape
    assert jnp.allclose(out, ref, atol=1e-4, rtol=1e-4), (out, ref)

    print("KERNEL_OK")
</pallas_src>

<mosaic_0001>
module attributes {stable_mosaic.version = 11 : i64} {
  func.func @_lstm_fused_kernel(%arg0: i32, %arg1: memref<64x4xf32, #tpu.memory_space<vmem>>, %arg2: memref<4x128xf32, #tpu.memory_space<vmem>>, %arg3: memref<32x128xf32, #tpu.memory_space<vmem>>, %arg4: memref<1x128xf32, #tpu.memory_space<vmem>>, %arg5: memref<32x128xf32, #tpu.memory_space<vmem>>, %arg6: memref<32x128xf32, #tpu.memory_space<vmem>>, %arg7: memref<1x128xf32, #tpu.memory_space<vmem>>, %arg8: memref<32x128xf32, #tpu.memory_space<vmem>>, %arg9: memref<1x128xf32, #tpu.memory_space<vmem>>, %arg10: memref<16x128xf32, #tpu.memory_space<vmem>>, %arg11: memref<64x128xf32, #tpu.memory_space<vmem>>) attributes {dimension_semantics = [#tpu.dimension_semantics<arbitrary>], iteration_bounds = array<i64: 1>, scalar_prefetch = 0 : i64, scratch_operands = 1 : i64, tpu.core_type = #tpu.core_type<tc>, window_params = [{pipeline_mode = #tpu.pipeline_mode<synchronous>, transform_indices = @transform_0, window_bounds = array<i64: 64, 4>}, {pipeline_mode = #tpu.pipeline_mode<synchronous>, transform_indices = @transform_1, window_bounds = array<i64: 4, 128>}, {pipeline_mode = #tpu.pipeline_mode<synchronous>, transform_indices = @transform_2, window_bounds = array<i64: 32, 128>}, {pipeline_mode = #tpu.pipeline_mode<synchronous>, transform_indices = @transform_3, window_bounds = array<i64: 1, 128>}, {pipeline_mode = #tpu.pipeline_mode<synchronous>, transform_indices = @transform_4, window_bounds = array<i64: 32, 128>}, {pipeline_mode = #tpu.pipeline_mode<synchronous>, transform_indices = @transform_5, window_bounds = array<i64: 32, 128>}, {pipeline_mode = #tpu.pipeline_mode<synchronous>, transform_indices = @transform_6, window_bounds = array<i64: 1, 128>}, {pipeline_mode = #tpu.pipeline_mode<synchronous>, transform_indices = @transform_7, window_bounds = array<i64: 32, 128>}, {pipeline_mode = #tpu.pipeline_mode<synchronous>, transform_indices = @transform_8, window_bounds = array<i64: 1, 128>}, {pipeline_mode = #tpu.pipeline_mode<synchronous>, transform_indices = @transform_9, window_bounds = array<i64: 16, 128>}]} {
    %c0 = arith.constant 0 : index
    %c0_0 = arith.constant 0 : index
    %0 = vector.load %arg3[%c0, %c0_0] : memref<32x128xf32, #tpu.memory_space<vmem>>, vector<32x128xf32>
    %c0_1 = arith.constant 0 : index
    %c0_2 = arith.constant 0 : index
    %1 = vector.load %arg6[%c0_1, %c0_2] : memref<32x128xf32, #tpu.memory_space<vmem>>, vector<32x128xf32>
    %c0_3 = arith.constant 0 : index
    %c0_4 = arith.constant 0 : index
    %2 = vector.load %arg5[%c0_3, %c0_4] : memref<32x128xf32, #tpu.memory_space<vmem>>, vector<32x128xf32>
    %c0_5 = arith.constant 0 : index
    %c0_6 = arith.constant 0 : index
    %3 = vector.load %arg7[%c0_5, %c0_6] : memref<1x128xf32, #tpu.memory_space<vmem>>, vector<1x128xf32>
    %c0_7 = arith.constant 0 : index
    %c0_8 = arith.constant 0 : index
    %4 = vector.load %arg1[%c0_7, %c0_8] : memref<64x4xf32, #tpu.memory_space<vmem>>, vector<64x4xf32>
    %c0_9 = arith.constant 0 : index
    %c0_10 = arith.constant 0 : index
    %5 = vector.load %arg2[%c0_9, %c0_10] : memref<4x128xf32, #tpu.memory_space<vmem>>, vector<4x128xf32>
    %cst = arith.constant dense<0.000000e+00> : vector<64x128xf32>
    %6 = tpu.matmul %4, %5, %cst {dimension_numbers = #tpu.dot_dimension_numbers<[1], [0], [0], [1], [0, 0, 1, 1], [], []>} : vector<64x4xf32>, vector<4x128xf32>, vector<64x128xf32> -> vector<64x128xf32>
    %c0_11 = arith.constant 0 : index
    %c0_12 = arith.constant 0 : index
    %7 = vector.load %arg4[%c0_11, %c0_12] : memref<1x128xf32, #tpu.memory_space<vmem>>, vector<1x128xf32>
    %8 = vector.broadcast %7 : vector<1x128xf32> to vector<64x128xf32>
    %9 = arith.addf %6, %8 : vector<64x128xf32>
    %c0_13 = arith.constant 0 : index
    %c0_14 = arith.constant 0 : index
    %10 = vector.load %arg11[%c0_13, %c0_14] : memref<64x128xf32, #tpu.memory_space<vmem>>, vector<64x128xf32>
    tpu.vector_store %arg11[%c0_13, %c0_14], %9 {strides = array<i32>} : memref<64x128xf32, #tpu.memory_space<vmem>>, vector<64x128xf32>,
    %cst_15 = arith.constant 0.000000e+00 : f32
    %11 = vector.broadcast %cst_15 : f32 to vector<8x32xf32>
    %c0_16 = arith.constant 0 : index
    %c0_17 = arith.constant 0 : index
    %12 = vector.load %arg11[%c0_16, %c0_17] : memref<64x128xf32, #tpu.memory_space<vmem>>, vector<8x128xf32>
    %cst_18 = arith.constant dense<0.000000e+00> : vector<8x128xf32>
    %13 = tpu.matmul %11, %0, %cst_18 {dimension_numbers = #tpu.dot_dimension_numbers<[1], [0], [0], [1], [0, 0, 1, 1], [], []>} : vector<8x32xf32>, vector<32x128xf32>, vector<8x128xf32> -> vector<8x128xf32>
    %14 = arith.addf %12, %13 : vector<8x128xf32>
    %15 = arith.negf %14 : vector<8x128xf32>
    %16 = math.exp %15 : vector<8x128xf32>
    %cst_19 = arith.constant 1.000000e+00 : f32
    %17 = vector.broadcast %cst_19 : f32 to vector<8x128xf32>
    %18 = arith.addf %17, %16 : vector<8x128xf32>
    %19 = arith.divf %17, %18 : vector<8x128xf32>
    %20 = vector.extract_strided_slice %14 {offsets = [0, 96], sizes = [8, 32], strides = [1, 1]} : vector<8x128xf32> to vector<8x32xf32>
    %21 = math.tanh %20 : vector<8x32xf32>
    %22 = vector.extract_strided_slice %19 {offsets = [0, 32], sizes = [8, 32], strides = [1, 1]} : vector<8x128xf32> to vector<8x32xf32>
    %23 = arith.mulf %22, %11 : vector<8x32xf32>
    %24 = vector.extract_strided_slice %19 {offsets = [0, 0], sizes = [8, 32], strides = [1, 1]} : vector<8x128xf32> to vector<8x32xf32>
    %25 = arith.mulf %24, %21 : vector<8x32xf32>
    %26 = arith.addf %23, %25 : vector<8x32xf32>
    %27 = vector.extract_strided_slice %19 {offsets = [0, 64], sizes = [8, 32], strides = [1, 1]} : vector<8x128xf32> to vector<8x32xf32>
    %28 = math.tanh %26 : vector<8x32xf32>
    %29 = arith.mulf %27, %28 : vector<8x32xf32>
    %cst_20 = arith.constant dense<0.000000e+00> : vector<8x128xf32>
    %30 = tpu.matmul %29, %2, %cst_20 {dimension_numbers = #tpu.dot_dimension_numbers<[1], [0], [0], [1], [0, 0, 1, 1], [], []>} : vector<8x32xf32>, vector<32x128xf32>, vector<8x128xf32> -> vector<8x128xf32>
    %31 = vector.broadcast %3 : vector<1x128xf32> to vector<8x128xf32>
    %32 = arith.addf %31, %30 : vector<8x128xf32>
    %cst_21 = arith.constant dense<0.000000e+00> : vector<8x128xf32>
    %33 = tpu.matmul %11, %1, %cst_21 {dimension_numbers = #tpu.dot_dimension_numbers<[1], [0], [0], [1], [0, 0, 1, 1], [], []>} : vector<8x32xf32>, vector<32x128xf32>, vector<8x128xf32> -> vector<8x128xf32>
    %34 = arith.addf %32, %33 : vector<8x128xf32>
    %35 = arith.negf %34 : vector<8x128xf32>
    %36 = math.exp %35 : vector<8x128xf32>
    %cst_22 = arith.constant 1.000000e+00 : f32
    %37 = vector.broadcast %cst_22 : f32 to vector<8x128xf32>
    %38 = arith.addf %37, %36 : vector<8x128xf32>
    %39 = arith.divf %37, %38 : vector<8x128xf32>
    %40 = vector.extract_strided_slice %34 {offsets = [0, 96], sizes = [8, 32], strides = [1, 1]} : vector<8x128xf32> to vector<8x32xf32>
    %41 = math.tanh %40 : vector<8x32xf32>
    %42 = vector.extract_strided_slice %39 {offsets = [0, 32], sizes = [8, 32], strides = [1, 1]} : vector<8x128xf32> to vector<8x32xf32>
    %43 = arith.mulf %42, %11 : vector<8x32xf32>
    %44 = vector.extract_strided_slice %39 {offsets = [0, 0], sizes = [8, 32], strides = [1, 1]} : vector<8x128xf32> to vector<8x32xf32>
    %45 = arith.mulf %44, %41 : vector<8x32xf32>
    %46 = arith.addf %43, %45 : vector<8x32xf32>
    %47 = vector.extract_strided_slice %39 {offsets = [0, 64], sizes = [8, 32], strides = [1, 1]} : vector<8x128xf32> to vector<8x32xf32>
    %48 = math.tanh %46 : vector<8x32xf32>
    %49 = arith.mulf %47, %48 : vector<8x32xf32>
    %c8 = arith.constant 8 : index
    %c0_23 = arith.constant 0 : index
    %50 = vector.load %arg11[%c8, %c0_23] : memref<64x128xf32, #tpu.memory_space<vmem>>, vector<8x128xf32>
    %cst_24 = arith.constant dense<0.000000e+00> : vector<8x128xf32>
    %51 = tpu.matmul %29, %0, %cst_24 {dimension_numbers = #tpu.dot_dimension_numbers<[1], [0], [0], [1], [0, 0, 1, 1], [], []>} : vector<8x32xf32>, vector<32x128xf32>, vector<8x128xf32> -> vector<8x128xf32>
    %52 = arith.addf %50, %51 : vector<8x128xf32>
    %53 = arith.negf %52 : vector<8x128xf32>
    %54 = math.exp %53 : vector<8x128xf32>
    %cst_25 = arith.constant 1.000000e+00 : f32
    %55 = vector.broadcast %cst_25 : f32 to vector<8x128xf32>
    %56 = arith.addf %55, %54 : vector<8x128xf32>
    %57 = arith.divf %55, %56 : vector<8x128xf32>
    %58 = vector.extract_strided_slice %52 {offsets = [0, 96], sizes = [8, 32], strides = [1, 1]} : vector<8x128xf32> to vector<8x32xf32>
    %59 = math.tanh %58 : vector<8x32xf32>
    %60 = vector.extract_strided_slice %57 {offsets = [0, 32], sizes = [8, 32], strides = [1, 1]} : vector<8x128xf32> to vector<8x32xf32>
    %61 = arith.mulf %60, %26 : vector<8x32xf32>
    %62 = vector.extract_strided_slice %57 {offsets = [0, 0], sizes = [8, 32], strides = [1, 1]} : vector<8x128xf32> to vector<8x32xf32>
    %63 = arith.mulf %62, %59 : vector<8x32xf32>
    %64 = arith.addf %61, %63 : vector<8x32xf32>
    %65 = vector.extract_strided_slice %57 {offsets = [0, 64], sizes = [8, 32], strides = [1, 1]} : vector<8x128xf32> to vector<8x32xf32>
    %66 = math.tanh %64 : vector<8x32xf32>
    %67 = arith.mulf %65, %66 : vector<8x32xf32>
    %cst_26 = arith.constant dense<0.000000e+00> : vector<8x128xf32>
    %68 = tpu.matmul %67, %2, %cst_26 {dimension_numbers = #tpu.dot_dimension_numbers<[1], [0], [0], [1], [0, 0, 1, 1], [], []>} : vector<8x32xf32>, vector<32x128xf32>, vector<8x128xf32> -> vector<8x128xf32>
    %69 = vector.broadcast %3 : vector<1x128xf32> to vector<8x128xf32>
    %70 = arith.addf %69, %68 : vector<8x128xf32>
    %cst_27 = arith.constant dense<0.000000e+00> : vector<8x128xf32>
    %71 = tpu.matmul %49, %1, %cst_27 {dimension_numbers = #tpu.dot_dimension_numbers<[1], [0], [0], [1], [0, 0, 1, 1], [], []>} : vector<8x32xf32>, vector<32x128xf32>, vector<8x128xf32> -> vector<8x128xf32>
    %72 = arith.addf %70, %71 : vector<8x128xf32>
    %73 = arith.negf %72 : vector<8x128xf32>
    %74 = math.exp %73 : vector<8x128xf32>
    %cst_28 = arith.constant 1.000000e+00 : f32
    %75 = vector.broadcast %cst_28 : f32 to vector<8x128xf32>
    %76 = arith.addf %75, %74 : vector<8x128xf32>
    %77 = arith.divf %75, %76 : vector<8x128xf32>
    %78 = vector.extract_strided_slice %72 {offsets = [0, 96], sizes = [8, 32], strides = [1, 1]} : vector<8x128xf32> to vector<8x32xf32>
    %79 = math.tanh %78 : vector<8x32xf32>
    %80 = vector.extract_strided_slice %77 {offsets = [0, 32], sizes = [8, 32], strides = [1, 1]} : vector<8x128xf32> to vector<8x32xf32>
    %81 = arith.mulf %80, %46 : vector<8x32xf32>
    %82 = vector.extract_strided_slice %77 {offsets = [0, 0], sizes = [8, 32], strides = [1, 1]} : vector<8x128xf32> to vector<8x32xf32>
    %83 = arith.mulf %82, %79 : vector<8x32xf32>
    %84 = arith.addf %81, %83 : vector<8x32xf32>
    %85 = vector.extract_strided_slice %77 {offsets = [0, 64], sizes = [8, 32], strides = [1, 1]} : vector<8x128xf32> to vector<8x32xf32>
    %86 = math.tanh %84 : vector<8x32xf32>
    %87 = arith.mulf %85, %86 : vector<8x32xf32>
    %c16 = arith.constant 16 : index
    %c0_29 = arith.constant 0 : index
    %88 = vector.load %arg11[%c16, %c0_29] : memref<64x128xf32, #tpu.memory_space<vmem>>, vector<8x128xf32>
    %cst_30 = arith.constant dense<0.000000e+00> : vector<8x128xf32>
    %89 = tpu.matmul %67, %0, %cst_30 {dimension_numbers = #tpu.dot_dimension_numbers<[1], [0], [0], [1], [0, 0, 1, 1], [], []>} : vector<8x32xf32>, vector<32x128xf32>, vector<8x128xf32> -> vector<8x128xf32>
    %90 = arith.addf %88, %89 : vector<8x128xf32>
    %91 = arith.negf %90 : vector<8x128xf32>
    %92 = math.exp %91 : vector<8x128xf32>
    %cst_31 = arith.constant 1.000000e+00 : f32
    %93 = vector.broadcast %cst_31 : f32 to vector<8x128xf32>
    %94 = arith.addf %93, %92 : vector<8x128xf32>
    %95 = arith.divf %93, %94 : vector<8x128xf32>
    %96 = vector.extract_strided_slice %90 {offsets = [0, 96], sizes = [8, 32], strides = [1, 1]} : vector<8x128xf32> to vector<8x32xf32>
    %97 = math.tanh %96 : vector<8x32xf32>
    %98 = vector.extract_strided_slice %95 {offsets = [0, 32], sizes = [8, 32], strides = [1, 1]} : vector<8x128xf32> to vector<8x32xf32>
    %99 = arith.mulf %98, %64 : vector<8x32xf32>
    %100 = vector.extract_strided_slice %95 {offsets = [0, 0], sizes = [8, 32], strides = [1, 1]} : vector<8x128xf32> to vector<8x32xf32>
    %101 = arith.mulf %100, %97 : vector<8x32xf32>
    %102 = arith.addf %99, %101 : vector<8x32xf32>
    %103 = vector.extract_strided_slice %95 {offsets = [0, 64], sizes = [8, 32], strides = [1, 1]} : vector<8x128xf32> to vector<8x32xf32>
    %104 = math.tanh %102 : vector<8x32xf32>
    %105 = arith.mulf %103, %104 : vector<8x32xf32>
    %cst_32 = arith.constant dense<0.000000e+00> : vector<8x128xf32>
    %106 = tpu.matmul %105, %2, %cst_32 {dimension_numbers = #tpu.dot_dimension_numbers<[1], [0], [0], [1], [0, 0, 1, 1], [], []>} : vector<8x32xf32>, vector<32x128xf32>, vector<8x128xf32> -> vector<8x128xf32>
    %107 = vector.broadcast %3 : vector<1x128xf32> to vector<8x128xf32>
    %108 = arith.addf %107, %106 : vector<8x128xf32>
    %cst_33 = arith.constant dense<0.000000e+00> : vector<8x128xf32>
    %109 = tpu.matmul %87, %1, %cst_33 {dimension_numbers = #tpu.dot_dimension_numbers<[1], [0], [0], [1], [0, 0, 1, 1], [], []>} : vector<8x32xf32>, vector<32x128xf32>, vector<8x128xf32> -> vector<8x128xf32>
    %110 = arith.addf %108, %109 : vector<8x128xf32>
    %111 = arith.negf %110 : vector<8x128xf32>
    %112 = math.exp %111 : vector<8x128xf32>
    %cst_34 = arith.constant 1.000000e+00 : f32
    %113 = vector.broadcast %cst_34 : f32 to vector<8x128xf32>
    %114 = arith.addf %113, %112 : vector<8x128xf32>
    %115 = arith.divf %113, %114 : vector<8x128xf32>
    %116 = vector.extract_strided_slice %110 {offsets = [0, 96], sizes = [8, 32], strides = [1, 1]} : vector<8x128xf32> to vector<8x32xf32>
    %117 = math.tanh %116 : vector<8x32xf32>
    %118 = vector.extract_strided_slice %115 {offsets = [0, 32], sizes = [8, 32], strides = [1, 1]} : vector<8x128xf32> to vector<8x32xf32>
    %119 = arith.mulf %118, %84 : vector<8x32xf32>
    %120 = vector.extract_strided_slice %115 {offsets = [0, 0], sizes = [8, 32], strides = [1, 1]} : vector<8x128xf32> to vector<8x32xf32>
    %121 = arith.mulf %120, %117 : vector<8x32xf32>
    %122 = arith.addf %119, %121 : vector<8x32xf32>
    %123 = vector.extract_strided_slice %115 {offsets = [0, 64], sizes = [8, 32], strides = [1, 1]} : vector<8x128xf32> to vector<8x32xf32>
    %124 = math.tanh %122 : vector<8x32xf32>
    %125 = arith.mulf %123, %124 : vector<8x32xf32>
    %c24 = arith.constant 24 : index
    %c0_35 = arith.constant 0 : index
    %126 = vector.load %arg11[%c24, %c0_35] : memref<64x128xf32, #tpu.memory_space<vmem>>, vector<8x128xf32>
    %cst_36 = arith.constant dense<0.000000e+00> : vector<8x128xf32>
    %127 = tpu.matmul %105, %0, %cst_36 {dimension_numbers = #tpu.dot_dimension_numbers<[1], [0], [0], [1], [0, 0, 1, 1], [], []>} : vector<8x32xf32>, vector<32x128xf32>, vector<8x128xf32> -> vector<8x128xf32>
    %128 = arith.addf %126, %127 : vector<8x128xf32>
    %129 = arith.negf %128 : vector<8x128xf32>
    %130 = math.exp %129 : vector<8x128xf32>
    %cst_37 = arith.constant 1.000000e+00 : f32
    %131 = vector.broadcast %cst_37 : f32 to vector<8x128xf32>
    %132 = arith.addf %131, %130 : vector<8x128xf32>
    %133 = arith.divf %131, %132 : vector<8x128xf32>
    %134 = vector.extract_strided_slice %128 {offsets = [0, 96], sizes = [8, 32], strides = [1, 1]} : vector<8x128xf32> to vector<8x32xf32>
    %135 = math.tanh %134 : vector<8x32xf32>
    %136 = vector.extract_strided_slice %133 {offsets = [0, 32], sizes = [8, 32], strides = [1, 1]} : vector<8x128xf32> to vector<8x32xf32>
    %137 = arith.mulf %136, %102 : vector<8x32xf32>
    %138 = vector.extract_strided_slice %133 {offsets = [0, 0], sizes = [8, 32], strides = [1, 1]} : vector<8x128xf32> to vector<8x32xf32>
    %139 = arith.mulf %138, %135 : vector<8x32xf32>
    %140 = arith.addf %137, %139 : vector<8x32xf32>
    %141 = vector.extract_strided_slice %133 {offsets = [0, 64], sizes = [8, 32], strides = [1, 1]} : vector<8x128xf32> to vector<8x32xf32>
    %142 = math.tanh %140 : vector<8x32xf32>
    %143 = arith.mulf %141, %142 : vector<8x32xf32>
    %cst_38 = arith.constant dense<0.000000e+00> : vector<8x128xf32>
    %144 = tpu.matmul %143, %2, %cst_38 {dimension_numbers = #tpu.dot_dimension_numbers<[1], [0], [0], [1], [0, 0, 1, 1], [], []>} : vector<8x32xf32>, vector<32x128xf32>, vector<8x128xf32> -> vector<8x128xf32>
    %145 = vector.broadcast %3 : vector<1x128xf32> to vector<8x128xf32>
    %146 = arith.addf %145, %144 : vector<8x128xf32>
    %cst_39 = arith.constant dense<0.000000e+00> : vector<8x128xf32>
    %147 = tpu.matmul %125, %1, %cst_39 {dimension_numbers = #tpu.dot_dimension_numbers<[1], [0], [0], [1], [0, 0, 1, 1], [], []>} : vector<8x32xf32>, vector<32x128xf32>, vector<8x128xf32> -> vector<8x128xf32>
    %148 = arith.addf %146, %147 : vector<8x128xf32>
    %149 = arith.negf %148 : vector<8x128xf32>
    %150 = math.exp %149 : vector<8x128xf32>
    %cst_40 = arith.constant 1.000000e+00 : f32
    %151 = vector.broadcast %cst_40 : f32 to vector<8x128xf32>
    %152 = arith.addf %151, %150 : vector<8x128xf32>
    %153 = arith.divf %151, %152 : vector<8x128xf32>
    %154 = vector.extract_strided_slice %148 {offsets = [0, 96], sizes = [8, 32], strides = [1, 1]} : vector<8x128xf32> to vector<8x32xf32>
    %155 = math.tanh %154 : vector<8x32xf32>
    %156 = vector.extract_strided_slice %153 {offsets = [0, 32], sizes = [8, 32], strides = [1, 1]} : vector<8x128xf32> to vector<8x32xf32>
    %157 = arith.mulf %156, %122 : vector<8x32xf32>
    %158 = vector.extract_strided_slice %153 {offsets = [0, 0], sizes = [8, 32], strides = [1, 1]} : vector<8x128xf32> to vector<8x32xf32>
    %159 = arith.mulf %158, %155 : vector<8x32xf32>
    %160 = arith.addf %157, %159 : vector<8x32xf32>
    %161 = vector.extract_strided_slice %153 {offsets = [0, 64], sizes = [8, 32], strides = [1, 1]} : vector<8x128xf32> to vector<8x32xf32>
    %162 = math.tanh %160 : vector<8x32xf32>
    %163 = arith.mulf %161, %162 : vector<8x32xf32>
    %c32 = arith.constant 32 : index
    %c0_41 = arith.constant 0 : index
    %164 = vector.load %arg11[%c32, %c0_41] : memref<64x128xf32, #tpu.memory_space<vmem>>, vector<8x128xf32>
    %cst_42 = arith.constant dense<0.000000e+00> : vector<8x128xf32>
    %165 = tpu.matmul %143, %0, %cst_42 {dimension_numbers = #tpu.dot_dimension_numbers<[1], [0], [0], [1], [0, 0, 1, 1], [], []>} : vector<8x32xf32>, vector<32x128xf32>, vector<8x128xf32> -> vector<8x128xf32>
    %166 = arith.addf %164, %165 : vector<8x128xf32>
    %167 = arith.negf %166 : vector<8x128xf32>
    %168 = math.exp %167 : vector<8x128xf32>
    %cst_43 = arith.constant 1.000000e+00 : f32
    %169 = vector.broadcast %cst_43 : f32 to vector<8x128xf32>
    %170 = arith.addf %169, %168 : vector<8x128xf32>
    %171 = arith.divf %169, %170 : vector<8x128xf32>
    %172 = vector.extract_strided_slice %166 {offsets = [0, 96], sizes = [8, 32], strides = [1, 1]} : vector<8x128xf32> to vector<8x32xf32>
    %173 = math.tanh %172 : vector<8x32xf32>
    %174 = vector.extract_strided_slice %171 {offsets = [0, 32], sizes = [8, 32], strides = [1, 1]} : vector<8x128xf32> to vector<8x32xf32>
    %175 = arith.mulf %174, %140 : vector<8x32xf32>
    %176 = vector.extract_strided_slice %171 {offsets = [0, 0], sizes = [8, 32], strides = [1, 1]} : vector<8x128xf32> to vector<8x32xf32>
    %177 = arith.mulf %176, %173 : vector<8x32xf32>
    %178 = arith.addf %175, %177 : vector<8x32xf32>
    %179 = vector.extract_strided_slice %171 {offsets = [0, 64], sizes = [8, 32], strides = [1, 1]} : vector<8x128xf32> to vector<8x32xf32>
    %180 = math.tanh %178 : vector<8x32xf32>
    %181 = arith.mulf %179, %180 : vector<8x32xf32>
    %cst_44 = arith.constant dense<0.000000e+00> : vector<8x128xf32>
    %182 = tpu.matmul %181, %2, %cst_44 {dimension_numbers = #tpu.dot_dimension_numbers<[1], [0], [0], [1], [0, 0, 1, 1], [], []>} : vector<8x32xf32>, vector<32x128xf32>, vector<8x128xf32> -> vector<8x128xf32>
    %183 = vector.broadcast %3 : vector<1x128xf32> to vector<8x128xf32>
    %184 = arith.addf %183, %182 : vector<8x128xf32>
    %cst_45 = arith.constant dense<0.000000e+00> : vector<8x128xf32>
    %185 = tpu.matmul %163, %1, %cst_45 {dimension_numbers = #tpu.dot_dimension_numbers<[1], [0], [0], [1], [0, 0, 1, 1], [], []>} : vector<8x32xf32>, vector<32x128xf32>, vector<8x128xf32> -> vector<8x128xf32>
    %186 = arith.addf %184, %185 : vector<8x128xf32>
    %187 = arith.negf %186 : vector<8x128xf32>
    %188 = math.exp %187 : vector<8x128xf32>
    %cst_46 = arith.constant 1.000000e+00 : f32
    %189 = vector.broadcast %cst_46 : f32 to vector<8x128xf32>
    %190 = arith.addf %189, %188 : vector<8x128xf32>
    %191 = arith.divf %189, %190 : vector<8x128xf32>
    %192 = vector.extract_strided_slice %186 {offsets = [0, 96], sizes = [8, 32], strides = [1, 1]} : vector<8x128xf32> to vector<8x32xf32>
    %193 = math.tanh %192 : vector<8x32xf32>
    %194 = vector.extract_strided_slice %191 {offsets = [0, 32], sizes = [8, 32], strides = [1, 1]} : vector<8x128xf32> to vector<8x32xf32>
    %195 = arith.mulf %194, %160 : vector<8x32xf32>
    %196 = vector.extract_strided_slice %191 {offsets = [0, 0], sizes = [8, 32], strides = [1, 1]} : vector<8x128xf32> to vector<8x32xf32>
    %197 = arith.mulf %196, %193 : vector<8x32xf32>
    %198 = arith.addf %195, %197 : vector<8x32xf32>
    %199 = vector.extract_strided_slice %191 {offsets = [0, 64], sizes = [8, 32], strides = [1, 1]} : vector<8x128xf32> to vector<8x32xf32>
    %200 = math.tanh %198 : vector<8x32xf32>
    %201 = arith.mulf %199, %200 : vector<8x32xf32>
    %c40 = arith.constant 40 : index
    %c0_47 = arith.constant 0 : index
    %202 = vector.load %arg11[%c40, %c0_47] : memref<64x128xf32, #tpu.memory_space<vmem>>, vector<8x128xf32>
    %cst_48 = arith.constant dense<0.000000e+00> : vector<8x128xf32>
    %203 = tpu.matmul %181, %0, %cst_48 {dimension_numbers = #tpu.dot_dimension_numbers<[1], [0], [0], [1], [0, 0, 1, 1], [], []>} : vector<8x32xf32>, vector<32x128xf32>, vector<8x128xf32> -> vector<8x128xf32>
    %204 = arith.addf %202, %203 : vector<8x128xf32>
    %205 = arith.negf %204 : vector<8x128xf32>
    %206 = math.exp %205 : vector<8x128xf32>
    %cst_49 = arith.constant 1.000000e+00 : f32
    %207 = vector.broadcast %cst_49 : f32 to vector<8x128xf32>
    %208 = arith.addf %207, %206 : vector<8x128xf32>
    %209 = arith.divf %207, %208 : vector<8x128xf32>
    %210 = vector.extract_strided_slice %204 {offsets = [0, 96], sizes = [8, 32], strides = [1, 1]} : vector<8x128xf32> to vector<8x32xf32>
    %211 = math.tanh %210 : vector<8x32xf32>
    %212 = vector.extract_strided_slice %209 {offsets = [0, 32], sizes = [8, 32], strides = [1, 1]} : vector<8x128xf32> to vector<8x32xf32>
    %213 = arith.mulf %212, %178 : vector<8x32xf32>
    %214 = vector.extract_strided_slice %209 {offsets = [0, 0], sizes = [8, 32], strides = [1, 1]} : vector<8x128xf32> to vector<8x32xf32>
    %215 = arith.mulf %214, %211 : vector<8x32xf32>
    %216 = arith.addf %213, %215 : vector<8x32xf32>
    %217 = vector.extract_strided_slice %209 {offsets = [0, 64], sizes = [8, 32], strides = [1, 1]} : vector<8x128xf32> to vector<8x32xf32>
    %218 = math.tanh %216 : vector<8x32xf32>
    %219 = arith.mulf %217, %218 : vector<8x32xf32>
    %cst_50 = arith.constant dense<0.000000e+00> : vector<8x128xf32>
    %220 = tpu.matmul %219, %2, %cst_50 {dimension_numbers = #tpu.dot_dimension_numbers<[1], [0], [0], [1], [0, 0, 1, 1], [], []>} : vector<8x32xf32>, vector<32x128xf32>, vector<8x128xf32> -> vector<8x128xf32>
    %221 = vector.broadcast %3 : vector<1x128xf32> to vector<8x128xf32>
    %222 = arith.addf %221, %220 : vector<8x128xf32>
    %cst_51 = arith.constant dense<0.000000e+00> : vector<8x128xf32>
    %223 = tpu.matmul %201, %1, %cst_51 {dimension_numbers = #tpu.dot_dimension_numbers<[1], [0], [0], [1], [0, 0, 1, 1], [], []>} : vector<8x32xf32>, vector<32x128xf32>, vector<8x128xf32> -> vector<8x128xf32>
    %224 = arith.addf %222, %223 : vector<8x128xf32>
    %225 = arith.negf %224 : vector<8x128xf32>
    %226 = math.exp %225 : vector<8x128xf32>
    %cst_52 = arith.constant 1.000000e+00 : f32
    %227 = vector.broadcast %cst_52 : f32 to vector<8x128xf32>
    %228 = arith.addf %227, %226 : vector<8x128xf32>
    %229 = arith.divf %227, %228 : vector<8x128xf32>
    %230 = vector.extract_strided_slice %224 {offsets = [0, 96], sizes = [8, 32], strides = [1, 1]} : vector<8x128xf32> to vector<8x32xf32>
    %231 = math.tanh %230 : vector<8x32xf32>
    %232 = vector.extract_strided_slice %229 {offsets = [0, 32], sizes = [8, 32], strides = [1, 1]} : vector<8x128xf32> to vector<8x32xf32>
    %233 = arith.mulf %232, %198 : vector<8x32xf32>
    %234 = vector.extract_strided_slice %229 {offsets = [0, 0], sizes = [8, 32], strides = [1, 1]} : vector<8x128xf32> to vector<8x32xf32>
    %235 = arith.mulf %234, %231 : vector<8x32xf32>
    %236 = arith.addf %233, %235 : vector<8x32xf32>
    %237 = vector.extract_strided_slice %229 {offsets = [0, 64], sizes = [8, 32], strides = [1, 1]} : vector<8x128xf32> to vector<8x32xf32>
    %238 = math.tanh %236 : vector<8x32xf32>
    %239 = arith.mulf %237, %238 : vector<8x32xf32>
    %c48 = arith.constant 48 : index
    %c0_53 = arith.constant 0 : index
    %240 = vector.load %arg11[%c48, %c0_53] : memref<64x128xf32, #tpu.memory_space<vmem>>, vector<8x128xf32>
    %cst_54 = arith.constant dense<0.000000e+00> : vector<8x128xf32>
    %241 = tpu.matmul %219, %0, %cst_54 {dimension_numbers = #tpu.dot_dimension_numbers<[1], [0], [0], [1], [0, 0, 1, 1], [], []>} : vector<8x32xf32>, vector<32x128xf32>, vector<8x128xf32> -> vector<8x128xf32>
    %242 = arith.addf %240, %241 : vector<8x128xf32>
    %243 = arith.negf %242 : vector<8x128xf32>
    %244 = math.exp %243 : vector<8x128xf32>
    %cst_55 = arith.constant 1.000000e+00 : f32
    %245 = vector.broadcast %cst_55 : f32 to vector<8x128xf32>
    %246 = arith.addf %245, %244 : vector<8x128xf32>
    %247 = arith.divf %245, %246 : vector<8x128xf32>
    %248 = vector.extract_strided_slice %242 {offsets = [0, 96], sizes = [8, 32], strides = [1, 1]} : vector<8x128xf32> to vector<8x32xf32>
    %249 = math.tanh %248 : vector<8x32xf32>
    %250 = vector.extract_strided_slice %247 {offsets = [0, 32], sizes = [8, 32], strides = [1, 1]} : vector<8x128xf32> to vector<8x32xf32>
    %251 = arith.mulf %250, %216 : vector<8x32xf32>
    %252 = vector.extract_strided_slice %247 {offsets = [0, 0], sizes = [8, 32], strides = [1, 1]} : vector<8x128xf32> to vector<8x32xf32>
    %253 = arith.mulf %252, %249 : vector<8x32xf32>
    %254 = arith.addf %251, %253 : vector<8x32xf32>
    %255 = vector.extract_strided_slice %247 {offsets = [0, 64], sizes = [8, 32], strides = [1, 1]} : vector<8x128xf32> to vector<8x32xf32>
    %256 = math.tanh %254 : vector<8x32xf32>
    %257 = arith.mulf %255, %256 : vector<8x32xf32>
    %cst_56 = arith.constant dense<0.000000e+00> : vector<8x128xf32>
    %258 = tpu.matmul %257, %2, %cst_56 {dimension_numbers = #tpu.dot_dimension_numbers<[1], [0], [0], [1], [0, 0, 1, 1], [], []>} : vector<8x32xf32>, vector<32x128xf32>, vector<8x128xf32> -> vector<8x128xf32>
    %259 = vector.broadcast %3 : vector<1x128xf32> to vector<8x128xf32>
    %260 = arith.addf %259, %258 : vector<8x128xf32>
    %cst_57 = arith.constant dense<0.000000e+00> : vector<8x128xf32>
    %261 = tpu.matmul %239, %1, %cst_57 {dimension_numbers = #tpu.dot_dimension_numbers<[1], [0], [0], [1], [0, 0, 1, 1], [], []>} : vector<8x32xf32>, vector<32x128xf32>, vector<8x128xf32> -> vector<8x128xf32>
    %262 = arith.addf %260, %261 : vector<8x128xf32>
    %263 = arith.negf %262 : vector<8x128xf32>
    %264 = math.exp %263 : vector<8x128xf32>
    %cst_58 = arith.constant 1.000000e+00 : f32
    %265 = vector.broadcast %cst_58 : f32 to vector<8x128xf32>
    %266 = arith.addf %265, %264 : vector<8x128xf32>
    %267 = arith.divf %265, %266 : vector<8x128xf32>
    %268 = vector.extract_strided_slice %262 {offsets = [0, 96], sizes = [8, 32], strides = [1, 1]} : vector<8x128xf32> to vector<8x32xf32>
    %269 = math.tanh %268 : vector<8x32xf32>
    %270 = vector.extract_strided_slice %267 {offsets = [0, 32], sizes = [8, 32], strides = [1, 1]} : vector<8x128xf32> to vector<8x32xf32>
    %271 = arith.mulf %270, %236 : vector<8x32xf32>
    %272 = vector.extract_strided_slice %267 {offsets = [0, 0], sizes = [8, 32], strides = [1, 1]} : vector<8x128xf32> to vector<8x32xf32>
    %273 = arith.mulf %272, %269 : vector<8x32xf32>
    %274 = arith.addf %271, %273 : vector<8x32xf32>
    %275 = vector.extract_strided_slice %267 {offsets = [0, 64], sizes = [8, 32], strides = [1, 1]} : vector<8x128xf32> to vector<8x32xf32>
    %276 = math.tanh %274 : vector<8x32xf32>
    %277 = arith.mulf %275, %276 : vector<8x32xf32>
    %c56 = arith.constant 56 : index
    %c0_59 = arith.constant 0 : index
    %278 = vector.load %arg11[%c56, %c0_59] : memref<64x128xf32, #tpu.memory_space<vmem>>, vector<8x128xf32>
    %cst_60 = arith.constant dense<0.000000e+00> : vector<8x128xf32>
    %279 = tpu.matmul %257, %0, %cst_60 {dimension_numbers = #tpu.dot_dimension_numbers<[1], [0], [0], [1], [0, 0, 1, 1], [], []>} : vector<8x32xf32>, vector<32x128xf32>, vector<8x128xf32> -> vector<8x128xf32>
    %280 = arith.addf %278, %279 : vector<8x128xf32>
    %281 = arith.negf %280 : vector<8x128xf32>
    %282 = math.exp %281 : vector<8x128xf32>
    %cst_61 = arith.constant 1.000000e+00 : f32
    %283 = vector.broadcast %cst_61 : f32 to vector<8x128xf32>
    %284 = arith.addf %283, %282 : vector<8x128xf32>
    %285 = arith.divf %283, %284 : vector<8x128xf32>
    %286 = vector.extract_strided_slice %280 {offsets = [0, 96], sizes = [8, 32], strides = [1, 1]} : vector<8x128xf32> to vector<8x32xf32>
    %287 = math.tanh %286 : vector<8x32xf32>
    %288 = vector.extract_strided_slice %285 {offsets = [0, 32], sizes = [8, 32], strides = [1, 1]} : vector<8x128xf32> to vector<8x32xf32>
    %289 = arith.mulf %288, %254 : vector<8x32xf32>
    %290 = vector.extract_strided_slice %285 {offsets = [0, 0], sizes = [8, 32], strides = [1, 1]} : vector<8x128xf32> to vector<8x32xf32>
    %291 = arith.mulf %290, %287 : vector<8x32xf32>
    %292 = arith.addf %289, %291 : vector<8x32xf32>
    %293 = vector.extract_strided_slice %285 {offsets = [0, 64], sizes = [8, 32], strides = [1, 1]} : vector<8x128xf32> to vector<8x32xf32>
    %294 = math.tanh %292 : vector<8x32xf32>
    %295 = arith.mulf %293, %294 : vector<8x32xf32>
    %cst_62 = arith.constant dense<0.000000e+00> : vector<8x128xf32>
    %296 = tpu.matmul %295, %2, %cst_62 {dimension_numbers = #tpu.dot_dimension_numbers<[1], [0], [0], [1], [0, 0, 1, 1], [], []>} : vector<8x32xf32>, vector<32x128xf32>, vector<8x128xf32> -> vector<8x128xf32>
    %297 = vector.broadcast %3 : vector<1x128xf32> to vector<8x128xf32>
    %298 = arith.addf %297, %296 : vector<8x128xf32>
    %cst_63 = arith.constant dense<0.000000e+00> : vector<8x128xf32>
    %299 = tpu.matmul %277, %1, %cst_63 {dimension_numbers = #tpu.dot_dimension_numbers<[1], [0], [0], [1], [0, 0, 1, 1], [], []>} : vector<8x32xf32>, vector<32x128xf32>, vector<8x128xf32> -> vector<8x128xf32>
    %300 = arith.addf %298, %299 : vector<8x128xf32>
    %301 = arith.negf %300 : vector<8x128xf32>
    %302 = math.exp %301 : vector<8x128xf32>
    %cst_64 = arith.constant 1.000000e+00 : f32
    %303 = vector.broadcast %cst_64 : f32 to vector<8x128xf32>
    %304 = arith.addf %303, %302 : vector<8x128xf32>
    %305 = arith.divf %303, %304 : vector<8x128xf32>
    %306 = vector.extract_strided_slice %300 {offsets = [0, 96], sizes = [8, 32], strides = [1, 1]} : vector<8x128xf32> to vector<8x32xf32>
    %307 = math.tanh %306 : vector<8x32xf32>
    %308 = vector.extract_strided_slice %305 {offsets = [0, 32], sizes = [8, 32], strides = [1, 1]} : vector<8x128xf32> to vector<8x32xf32>
    %309 = arith.mulf %308, %274 : vector<8x32xf32>
    %310 = vector.extract_strided_slice %305 {offsets = [0, 0], sizes = [8, 32], strides = [1, 1]} : vector<8x128xf32> to vector<8x32xf32>
    %311 = arith.mulf %310, %307 : vector<8x32xf32>
    %312 = arith.addf %309, %311 : vector<8x32xf32>
    %313 = vector.extract_strided_slice %305 {offsets = [0, 64], sizes = [8, 32], strides = [1, 1]} : vector<8x128xf32> to vector<8x32xf32>
    %314 = math.tanh %312 : vector<8x32xf32>
    %315 = arith.mulf %313, %314 : vector<8x32xf32>
    %c0_65 = arith.constant 0 : index
    %c0_66 = arith.constant 0 : index
    %316 = vector.load %arg8[%c0_65, %c0_66] : memref<32x128xf32, #tpu.memory_space<vmem>>, vector<32x128xf32>
    %c0_67 = arith.constant 0 : index
    %c0_68 = arith.constant 0 : index
    %317 = vector.load %arg9[%c0_67, %c0_68] : memref<1x128xf32, #tpu.memory_space<vmem>>, vector<1x128xf32>
    %cst_69 = arith.constant dense<0.000000e+00> : vector<8x128xf32>
    %318 = tpu.matmul %295, %316, %cst_69 {dimension_numbers = #tpu.dot_dimension_numbers<[1], [0], [0], [1], [0, 0, 1, 1], [], []>} : vector<8x32xf32>, vector<32x128xf32>, vector<8x128xf32> -> vector<8x128xf32>
    %319 = vector.broadcast %317 : vector<1x128xf32> to vector<8x128xf32>
    %320 = arith.addf %318, %319 : vector<8x128xf32>
    %c0_70 = arith.constant 0 : index
    %c0_71 = arith.constant 0 : index
    %321 = vector.load %arg10[%c0_70, %c0_71] : memref<16x128xf32, #tpu.memory_space<vmem>>, vector<8x128xf32>
    tpu.vector_store %arg10[%c0_70, %c0_71], %320 {strides = array<i32>} : memref<16x128xf32, #tpu.memory_space<vmem>>, vector<8x128xf32>,
    %cst_72 = arith.constant dense<0.000000e+00> : vector<8x128xf32>
    %322 = tpu.matmul %315, %316, %cst_72 {dimension_numbers = #tpu.dot_dimension_numbers<[1], [0], [0], [1], [0, 0, 1, 1], [], []>} : vector<8x32xf32>, vector<32x128xf32>, vector<8x128xf32> -> vector<8x128xf32>
    %323 = vector.broadcast %317 : vector<1x128xf32> to vector<8x128xf32>
    %324 = arith.addf %322, %323 : vector<8x128xf32>
    %c8_73 = arith.constant 8 : index
    %c0_74 = arith.constant 0 : index
    %325 = vector.load %arg10[%c8_73, %c0_74] : memref<16x128xf32, #tpu.memory_space<vmem>>, vector<8x128xf32>
    tpu.vector_store %arg10[%c8_73, %c0_74], %324 {strides = array<i32>} : memref<16x128xf32, #tpu.memory_space<vmem>>, vector<8x128xf32>,
    return
  }
  func.func @transform_0(%arg0: i32) -> (i32, i32) {
    %c0_i32 = arith.constant 0 : i32
    %c0_i32_0 = arith.constant 0 : i32
    %c0_i32_1 = arith.constant 0 : i32
    return %c0_i32, %c0_i32_0 : i32, i32
  }
  func.func @transform_1(%arg0: i32) -> (i32, i32) {
    %c0_i32 = arith.constant 0 : i32
    %c0_i32_0 = arith.constant 0 : i32
    %c0_i32_1 = arith.constant 0 : i32
    return %c0_i32, %c0_i32_0 : i32, i32
  }
  func.func @transform_2(%arg0: i32) -> (i32, i32) {
    %c0_i32 = arith.constant 0 : i32
    %c0_i32_0 = arith.constant 0 : i32
    %c0_i32_1 = arith.constant 0 : i32
    return %c0_i32, %c0_i32_0 : i32, i32
  }
  func.func @transform_3(%arg0: i32) -> (i32, i32) {
    %c0_i32 = arith.constant 0 : i32
    %c0_i32_0 = arith.constant 0 : i32
    %c0_i32_1 = arith.constant 0 : i32
    return %c0_i32, %c0_i32_0 : i32, i32
  }
  func.func @transform_4(%arg0: i32) -> (i32, i32) {
    %c0_i32 = arith.constant 0 : i32
    %c0_i32_0 = arith.constant 0 : i32
    %c0_i32_1 = arith.constant 0 : i32
    return %c0_i32, %c0_i32_0 : i32, i32
  }
  func.func @transform_5(%arg0: i32) -> (i32, i32) {
    %c0_i32 = arith.constant 0 : i32
    %c0_i32_0 = arith.constant 0 : i32
    %c0_i32_1 = arith.constant 0 : i32
    return %c0_i32, %c0_i32_0 : i32, i32
  }
  func.func @transform_6(%arg0: i32) -> (i32, i32) {
    %c0_i32 = arith.constant 0 : i32
    %c0_i32_0 = arith.constant 0 : i32
    %c0_i32_1 = arith.constant 0 : i32
    return %c0_i32, %c0_i32_0 : i32, i32
  }
  func.func @transform_7(%arg0: i32) -> (i32, i32) {
    %c0_i32 = arith.constant 0 : i32
    %c0_i32_0 = arith.constant 0 : i32
    %c0_i32_1 = arith.constant 0 : i32
    return %c0_i32, %c0_i32_0 : i32, i32
  }
  func.func @transform_8(%arg0: i32) -> (i32, i32) {
    %c0_i32 = arith.constant 0 : i32
    %c0_i32_0 = arith.constant 0 : i32
    %c0_i32_1 = arith.constant 0 : i32
    return %c0_i32, %c0_i32_0 : i32, i32
  }
  func.func @transform_9(%arg0: i32) -> (i32, i32) {
    %c0_i32 = arith.constant 0 : i32
    %c0_i32_0 = arith.constant 0 : i32
    %c0_i32_1 = arith.constant 0 : i32
    return %c0_i32, %c0_i32_0 : i32, i32
  }
}

</mosaic_0001>

<bundles_post_ra>
// kernel: tpu_custom_call.1
= control target key start
LH: loop header
LB: loop body
LE: loop exit
PB: predicated region body
PF: predicated region fallthrough
CT: control target
= control target key end

     0   :  { %14 = vsyncpa [#allocation4], 0  ;;  %s3990_s0 = inlined_call_operand.vmem [shape: f32[64,4], index: 0, kind: input, shape index: {}]   ;;  %s3991_s1 = inlined_call_operand.vmem [shape: f32[4,128], index: 1, kind: input, shape index: {}]   ;;  %s3992_s2 = inlined_call_operand.vmem [shape: f32[32,128], index: 2, kind: input, shape index: {}]   ;;  %s3993_s3 = inlined_call_operand.vmem [shape: f32[1,128], index: 3, kind: input, shape index: {}]   ;;  %s3994_s4 = inlined_call_operand.vmem [shape: f32[32,128], index: 4, kind: input, shape index: {}]   ;;  %s3995_s5 = inlined_call_operand.hbm [shape: f32[32,128], index: 5, kind: input, shape index: {}]   ;;  %s3996_s6 = inlined_call_operand.vmem [shape: f32[1,128], index: 6, kind: input, shape index: {}]   ;;  %s3997_s7 = inlined_call_operand.hbm [shape: f32[32,128], index: 7, kind: input, shape index: {}]   ;;  %s3998_s8 = inlined_call_operand.vmem [shape: f32[1,128], index: 8, kind: input, shape index: {}]   ;;  %s3999_s9 = inlined_call_operand.hbm [shape: f32[16,128], index: 9, kind: output, shape index: {}]  }
   0x1   :  { %15 = vsyncpa [#allocation7], 0 }
   0x2   :  { %16 = vsyncpa [#allocation5], 0  ;;  %s3470_s30 = smov [#allocation3]   ;;  %s3398_s13 = scalar_lea.hbm %s3995_s5, 512 }
   0x3   :  { %s32_s10 = sshll.u32 %s3470_s30, 4  ;;  %p3399_p0 = scmp.ne.s32.totalorder %s3995_s5, %s3398_s13  ;;  %s33_s10 = int_to_ptr.vmem [resolvable:$true] %s32_s10 }
   0x4   :  { %p3402_p1 = scmp.lt.u32.totalorder %s3398_s13, %s3995_s5 }
   0x6   :  { %p3404_p2 = pnand %p3402_p1, %p3399_p0 }
   0x8   :  { %3407 = shalt.err (!%p3404_p2)
}
   0x9   :  { %s3408_s18 = scalar_lea.vmem %s33_s10, 512  ;;  %p3413_p4 = scmp.lt.s32.totalorder %s33_s10, %s33_s10 }
   0xa   :  { %p3409_p3 = scmp.ne.s32.totalorder %s33_s10, %s3408_s18  ;;  %p3414_p5 = scmp.lt.s32.totalorder %s3408_s18, %s3408_s18 }
   0xc   :  { %p3415_p6 = por %p3414_p5, %p3413_p4 }
   0xe   :  { %p3416_p7 = pnand %p3415_p6, %p3409_p3 }
  0x10   :  { %3419 = shalt.err (!%p3416_p7)
}
  0x11   :  { %s3471_s19 = smov 128   ;;  %s3472_s20 = smov 8  }
  0x12   :  { %38 = dma.hbm_to_vmem [thread:$0]  %s3995_s5, 512, %s33_s10, [#allocation4], %s3471_s19, %s3471_s19, %s3472_s20  }
  0x13   :  { %s3473_s23 = smov [#allocation6]   ;;  %s3420_s27 = scalar_lea.hbm %s3997_s7, 512 }
  0x14   :  { %s46_s24 = sshll.u32 %s3473_s23, 4  ;;  %p3421_p8 = scmp.ne.s32.totalorder %s3997_s7, %s3420_s27  ;;  %s47_s24 = int_to_ptr.vmem [resolvable:$true] %s46_s24 }
  0x15   :  { %p3424_p9 = scmp.lt.u32.totalorder %s3420_s27, %s3997_s7 }
  0x17   :  { %p3426_p10 = pnand %p3424_p9, %p3421_p8 }
  0x19   :  { %3429 = shalt.err (!%p3426_p10)
}
  0x1a   :  { %s3430_s12 = scalar_lea.vmem %s47_s24, 512  ;;  %p3435_p12 = scmp.lt.s32.totalorder %s47_s24, %s47_s24 }
  0x1b   :  { %p3431_p11 = scmp.ne.s32.totalorder %s47_s24, %s3430_s12  ;;  %p3436_p13 = scmp.lt.s32.totalorder %s3430_s12, %s3430_s12 }
  0x1d   :  { %p3437_p0 = por %p3436_p13, %p3435_p12 }
  0x1f   :  { %p3438_p1 = pnand %p3437_p0, %p3431_p11 }
  0x21   :  { %3441 = shalt.err (!%p3438_p1)
}
  0x22   :  { %52 = dma.hbm_to_vmem [thread:$0]  %s3997_s7, 512, %s47_s24, [#allocation7], %s3471_s19, %s3471_s19, %s3472_s20  }
  0x23   :  { %3464 = dma.done.wait [#allocation4], 512  }
  0x24   :  { %3465 = vsyncadd [#allocation4], 4294966784 }
  0x25   :  { %3466 = dma.done.wait [#allocation7], 512  }
  0x26   :  { %3467 = vsyncadd [#allocation7], 4294966784  ;;  %v3474_v0 = vmov 0.0|0.0   ;;  %vm3475_vm0 = vmmov 0   ;;  %v3476_v1 = vmov 0.0   ;;  %vm115_vm1 = vcmask 1043456  }
  0x27   :  { %3080 = vmatprep.subr.bf16.mxu1 %v3474_v0  ;;  %2802 = vmatprep.mubr.msk.f32.mxu1 %vm3475_vm0, %v3476_v1  ;;  %vm90_vm2 = vcmask 31744   ;;  %v61_v2 = vld [vmem:[%s3992_s2] sm:$0xff]  ;;  %v62_v3 = vld [vmem:[%s3992_s2 + $0x8] sm:$0xff]  ;;  %v63_v8 = vld [vmem:[%s3992_s2 + $0x10] sm:$0xff]  ;;  %s3477_s28 = smov 32   ;;  %vm233_vm3 = vcmask 261120  }
  0x28   :  { %v82_v4 = vld [vmem:[%s3991_s1] sm:$0xf]  ;;  %v3572_v5 = vpack.c.bf16 %v62_v3, %v61_v2  ;;  %v75_v7 = vld [vmem:[%s3990_s0 + $0x8] sm:$0xff]  ;;  %v64_v9 = vld [vmem:[%s3992_s2 + $0x18] sm:$0xff] }
  0x29   :  { %2780 = vmatprep.subr.msk.mxu0 %vm115_vm1, %v82_v4  ;;  %v74_v6 = vld [vmem:[%s3990_s0] sm:$0xff]  ;;  %v3589_v10 = vpack.c.bf16 %v64_v9, %v63_v8  ;;  %v76_v28 = vld [vmem:[%s3990_s0 + $0x10] sm:$0xff]  ;;  %v77_v29 = vld [vmem:[%s3990_s0 + $0x18] sm:$0xff] }
  0x2a   :  { %2781 = vmatpush3.msk.msra.mxu0 %vm115_vm1, %v82_v4  ;;  %2782 = vmatprep.mubr.msk.f32.mxu0 %vm90_vm2, %v74_v6  ;;  %v3607_v12 = vld [vmem:[%s3993_s3] ss:$0 sm:$0xff]  ;;  %v70_v32 = vld [vmem:[%s3994_s4 + $0x8] sm:$0xff]  ;;  %v71_v34 = vld [vmem:[%s3994_s4 + $0x10] sm:$0xff] }
  0x2b   :  { %3082 = vmatpush3.bf16.msra.mxu1 %v3572_v5  ;;  %2783 = vmatmul.mubr.msk.f32.vlgmr.msra.gmra.mrb[0].mxu0 %vm90_vm2, %v75_v7  ;;  %v78_v30 = vld [vmem:[%s3990_s0 + $0x20] sm:$0xff]  ;;  %v79_v35 = vld [vmem:[%s3990_s0 + $0x28] sm:$0xff]  ;;  %v72_v36 = vld [vmem:[%s3994_s4 + $0x18] sm:$0xff] }
  0x2c   :  { %3083 = vmatprep.subr.bf16.mxu1 %v3474_v0  ;;  %3098 = vmatprep.subr.bf16.mxu0 %v3474_v0  ;;  %v69_v31 = vld [vmem:[%s3994_s4] sm:$0xff]  ;;  %v80_v37 = vld [vmem:[%s3990_s0 + $0x30] sm:$0xff]  ;;  %v3648_v38 = vpack.c.bf16 %v72_v36, %v71_v34  ;;  %v81_v39 = vld [vmem:[%s3990_s0 + $0x38] sm:$0xff]  ;;  %s3478_s4 = smov 64  }
  0x2d   :  { %3100 = vmatpush3.bf16.msra.mxu0 %v3572_v5  ;;  %2785 = vmatprep.mubr.msk.f32.mxu0 %vm90_vm2, %v76_v28  ;;  %v3632_v33 = vpack.c.bf16 %v70_v32, %v69_v31  ;;  %v65_v49 = vld [vmem:[#allocation3] sm:$0xff]  ;;  %v66_v50 = vld [vmem:[#allocation3 + $0x8] sm:$0xff]  ;;  %v67_v52 = vld [vmem:[#allocation3 + $0x10] sm:$0xff] }
  0x2e   :  { %3101 = vmatprep.subr.bf16.mxu0 %v3474_v0  ;;  %v3675_v51 = vpack.c.bf16 %v66_v50, %v65_v49  ;;  %v68_v53 = vld [vmem:[#allocation3 + $0x18] sm:$0xff] }
  0x2f   :  { %3085 = vmatpush3.bf16.msra.mxu1 %v3589_v10  ;;  %2786 = vmatmul.mubr.msk.f32.gmra.mrb[2].mxu0 %vm90_vm2, %v77_v29  ;;  %v3680_v55 = vpack.c.bf16 %v68_v53, %v67_v52  ;;  %v3705_v60 = vld [vmem:[%s3996_s6] ss:$0 sm:$0xff] }
  0x30   :  { %3086 = vmatprep.subr.bf16.mxu1 %v3474_v0  ;;  %2788 = vmatprep.mubr.msk.f32.mxu0 %vm90_vm2, %v78_v30 }
  0x31   :  { %3103 = vmatpush3.bf16.msra.mxu0 %v3589_v10 }
  0x32   :  { %2803 = vmatmul.mubr.f32.vlgmr.msra.gmra.mrb[0].mxu1 %v3476_v1  ;;  %3104 = vmatprep.subr.bf16.mxu0 %v3474_v0 }
  0x33   :  { %2813 = vmatprep.mubr.msk.f32.mxu1 %vm3475_vm0, %v3476_v1  ;;  %3088 = vmatpush3.bf16.msra.mxu1 %v3632_v33 }
  0x34   :  { %3089 = vmatprep.subr.bf16.mxu1 %v3474_v0  ;;  %2789 = vmatmul.mubr.msk.f32.gmra.mrb[4].mxu0 %vm90_vm2, %v79_v35 }
  0x35   :  { %2791 = vmatprep.mubr.msk.f32.mxu0 %vm90_vm2, %v80_v37 }
  0x37   :  { %3091 = vmatpush3.bf16.msra.mxu1 %v3648_v38 }
  0x38   :  { %3092 = vmatprep.subr.bf16.mxu1 %v3474_v0  ;;  %2792 = vmatmul.mubr.msk.f32.gmra.mrb[6].mxu0 %vm90_vm2, %v81_v39 }
  0x39   :  { %2835 = vmatprep.mubr.msk.f32.mxu0 %vm3475_vm0, %v3476_v1 }
  0xfe   :  { %v3602_v11 = vpop.f32.mrb[0].mxu0 }
  0xff   :  { %v185_v13 = vpop.f32.mrb[1].mxu0  ;;  %v191_v56 = vadd.f32 %v3602_v11, %v3607_v12 }
 0x100   :  { %v186_v14 = vadd.f32 %v3607_v12, %v185_v13 }
 0x102   :  { %v3663_v43 = vpop.f32.mrb[2].mxu0 }
 0x103   :  { %v3665_v44 = vpop.f32.mrb[3].mxu0 }
 0x104   :  { %v196_v34 = vadd.f32 %v3607_v12, %v3665_v44 }
 0x105   :  { %v303_v15 = vpop.f32.mrb[0].mxu1 }
 0x106   :  { %v307_v16 = vadd.f32 %v303_v15, %v186_v14  ;;  %v2804_v17 = vpop.f32.mrb[1].mxu1 }
 0x107   :  { %v3667_v45 = vpop.f32.mrb[4].mxu0 }
 0x108   :  { %3270 = vtanh.f32 %v307_v16  ;;  %v2599_v19 = vmul.f32 -1.442695, %v307_v16  ;;  %v3669_v46 = vpop.f32.mrb[5].mxu0 }
 0x10a   :  { %3272 = vpow2.f32 %v2599_v19 }
 0x10b   :  { %v3671_v47 = vpop.f32.mrb[6].mxu0 }
 0x10c   :  { %v3673_v48 = vpop.f32.mrb[7].mxu0 }
 0x112   :  { %v3271_v18 = vpop.eup %3270 }
 0x113   :  { %317 = vrot.lane.b32.xlu0 %v3271_v18, %s3477_s28 }
 0x114   :  { %v3273_v20 = vpop.eup %3272 }
 0x115   :  { %v311_v21 = vadd.f32 1.0, %v3273_v20 }
 0x117   :  { %3274 = vrcp.f32 %v311_v21 }
 0x121   :  { %v3275_v22 = vpop.eup %3274 }
 0x122   :  { %v315_v25 = vmul.f32 0.0, %v3275_v22 }
 0x185   :  { %v318_v23 = vpop.permute.xlu0 %317 }
 0x186   :  { %v320_v24 = vmul.f32 %v3275_v22, %v318_v23 }
 0x188   :  { %322 = vrot.lane.b32.xlu0 %v320_v24, %s3477_s28 }
 0x1fa   :  { %v323_v26 = vpop.permute.xlu0 %322 }
 0x1fb   :  { %v3612_v27 = vadd.f32 %v323_v26, %v315_v25 }
 0x1fd   :  { %3276 = vtanh.f32 %v3612_v27 }
 0x207   :  { %v3277_v40 = vpop.eup %3276 }
 0x208   :  { %328 = vrot.lane.b32.xlu1 %v3277_v40, %s3477_s28 }
 0x27a   :  { %v329_v41 = vpop.permute.xlu1 %328 }
 0x27b   :  { %v331_v42 = vmul.f32 %v3275_v22, %v329_v41 }
 0x27d   :  { %333 = vrot.lane.b32.xlu1 %v331_v42, %s3478_s4 }
 0x2ef   :  { %v334_v54 = vpop.permute.xlu1 %333 }
 0x2f0   :  { %2814 = vmatmul.mubr.msk.f32.vlgmr.msra.gmra.mrb[2].mxu1 %vm233_vm3, %v334_v54  ;;  %2836 = vmatmul.mubr.msk.f32.vlgmr.msra.gmra.mrb[8].mxu0 %vm233_vm3, %v334_v54 }
 0x2f1   :  { %3094 = vmatpush3.bf16.msra.mxu1 %v3675_v51  ;;  %2824 = vmatprep.mubr.msk.f32.mxu1 %vm3475_vm0, %v3476_v1 }
 0x2f2   :  { %3095 = vmatprep.subr.bf16.mxu1 %v3474_v0  ;;  %3106 = vmatpush3.bf16.msra.mxu0 %v3632_v33 }
 0x2f3   :  { %3107 = vmatprep.subr.bf16.mxu0 %v3474_v0  ;;  %2846 = vmatprep.mubr.msk.f32.mxu0 %vm3475_vm0, %v3476_v1 }
 0x2f5   :  { %3097 = vmatpush3.bf16.msra.mxu1 %v3680_v55 }
 0x2f6   :  { %3116 = vmatprep.subr.bf16.mxu1 %v3474_v0  ;;  %3109 = vmatpush3.bf16.msra.mxu0 %v3648_v38 }
 0x2f7   :  { %3110 = vmatprep.subr.bf16.mxu0 %v3474_v0 }
 0x2f8   :  { %2825 = vmatmul.mubr.f32.vlgmr.msra.gmra.mrb[2].mxu1 %v3476_v1 }
 0x2f9   :  { %3118 = vmatpush3.bf16.msra.mxu1 %v3572_v5  ;;  %2868 = vmatprep.mubr.msk.f32.mxu1 %vm3475_vm0, %v3476_v1 }
 0x2fa   :  { %3119 = vmatprep.subr.bf16.mxu1 %v3474_v0 }
 0x2fd   :  { %3121 = vmatpush3.bf16.msra.mxu1 %v3589_v10 }
 0x2fe   :  { %3122 = vmatprep.subr.bf16.mxu1 %v3474_v0 }
 0x3c3   :  { %v576_v57 = vpop.f32.mrb[8].mxu0 }
 0x3c4   :  { %v580_v58 = vadd.f32 %v576_v57, %v191_v56  ;;  %v2837_v59 = vpop.f32.mrb[9].mxu0 }
 0x3c6   :  { %3278 = vtanh.f32 %v580_v58  ;;  %v2604_v4 = vmul.f32 -1.442695, %v580_v58 }
 0x3cb   :  { %v480_v61 = vpop.f32.mrb[2].mxu1 }
 0x3cc   :  { %v3236_v62 = vadd.f32 %v3705_v60, %v480_v61  ;;  %v2826_v63 = vpop.f32.mrb[3].mxu1 }
 0x3ce   :  { %3280 = vtanh.f32 %v3236_v62  ;;  %v2602_v6 = vmul.f32 -1.442695, %v3236_v62 }
 0x3cf   :  { %3282 = vpow2.f32 %v2604_v4 }
 0x3d0   :  { %v3279_v2 = vpop.eup %3278  ;;  %3284 = vpow2.f32 %v2602_v6 }
 0x3d1   :  { %590 = vrot.lane.b32.xlu0 %v3279_v2, %s3477_s28 }
 0x3d8   :  { %v3281_v3 = vpop.eup %3280 }
 0x3d9   :  { %494 = vrot.lane.b32.xlu1 %v3281_v3, %s3477_s28  ;;  %v3283_v7 = vpop.eup %3282 }
 0x3da   :  { %v584_v8 = vadd.f32 1.0, %v3283_v7  ;;  %v3285_v9 = vpop.eup %3284 }
 0x3db   :  { %v488_v11 = vadd.f32 1.0, %v3285_v9 }
 0x3dc   :  { %3286 = vrcp.f32 %v584_v8 }
 0x3dd   :  { %3288 = vrcp.f32 %v488_v11 }
 0x3e6   :  { %v3287_v13 = vpop.eup %3286 }
 0x3e7   :  { %v3289_v16 = vpop.eup %3288  ;;  %v588_v19 = vmul.f32 %v3287_v13, %v3612_v27 }
 0x3e8   :  { %v492_v22 = vmul.f32 0.0, %v3289_v16 }
 0x443   :  { %v591_v14 = vpop.permute.xlu0 %590 }
 0x444   :  { %v593_v15 = vmul.f32 %v3287_v13, %v591_v14 }
 0x446   :  { %595 = vrot.lane.b32.xlu0 %v593_v15, %s3477_s28 }
 0x44b   :  { %v495_v17 = vpop.permute.xlu1 %494 }
 0x44c   :  { %v497_v18 = vmul.f32 %v3289_v16, %v495_v17 }
 0x44e   :  { %499 = vrot.lane.b32.xlu1 %v497_v18, %s3477_s28 }
 0x4b8   :  { %v596_v20 = vpop.permute.xlu0 %595 }
 0x4b9   :  { %v3713_v21 = vadd.f32 %v596_v20, %v588_v19  ;;  %v201_v19 = vadd.f32 %v3663_v43, %v3607_v12 }
 0x4bb   :  { %3290 = vtanh.f32 %v3713_v21 }
 0x4c0   :  { %v500_v23 = vpop.permute.xlu1 %499 }
 0x4c1   :  { %v3716_v24 = vadd.f32 %v500_v23, %v492_v22 }
 0x4c3   :  { %3292 = vtanh.f32 %v3716_v24 }
 0x4c5   :  { %v3291_v25 = vpop.eup %3290 }
 0x4c6   :  { %601 = vrot.lane.b32.xlu0 %v3291_v25, %s3477_s28 }
 0x4cd   :  { %v3293_v26 = vpop.eup %3292 }
 0x4ce   :  { %505 = vrot.lane.b32.xlu1 %v3293_v26, %s3477_s28 }
 0x538   :  { %v602_v28 = vpop.permute.xlu0 %601 }
 0x539   :  { %v604_v29 = vmul.f32 %v3287_v13, %v602_v28 }
 0x53b   :  { %606 = vrot.lane.b32.xlu0 %v604_v29, %s3478_s4 }
 0x540   :  { %v506_v27 = vpop.permute.xlu1 %505 }
 0x541   :  { %v508_v30 = vmul.f32 %v3289_v16, %v506_v27 }
 0x543   :  { %682 = vrot.lane.b32.xlu1 %v508_v30, %s3478_s4 }
 0x5ad   :  { %v607_v31 = vpop.permute.xlu0 %606 }
 0x5ae   :  { %2847 = vmatmul.mubr.msk.f32.vlgmr.msra.gmra.mrb[10].mxu0 %vm233_vm3, %v607_v31  ;;  %2869 = vmatmul.mubr.msk.f32.vlgmr.msra.gmra.mrb[4].mxu1 %vm233_vm3, %v607_v31 }
 0x5af   :  { %3112 = vmatpush3.bf16.msra.mxu0 %v3675_v51  ;;  %2857 = vmatprep.mubr.msk.f32.mxu0 %vm3475_vm0, %v3476_v1 }
 0x5b0   :  { %3113 = vmatprep.subr.bf16.mxu0 %v3474_v0  ;;  %3124 = vmatpush3.bf16.msra.mxu1 %v3632_v33 }
 0x5b1   :  { %3125 = vmatprep.subr.bf16.mxu1 %v3474_v0  ;;  %2879 = vmatprep.mubr.msk.f32.mxu1 %vm3475_vm0, %v3476_v1 }
 0x5b3   :  { %3115 = vmatpush3.bf16.msra.mxu0 %v3680_v55 }
 0x5b4   :  { %3134 = vmatprep.subr.bf16.mxu0 %v3474_v0  ;;  %3127 = vmatpush3.bf16.msra.mxu1 %v3648_v38 }
 0x5b5   :  { %v683_v32 = vpop.permute.xlu1 %682  ;;  %3128 = vmatprep.subr.bf16.mxu1 %v3474_v0 }
 0x5b6   :  { %2858 = vmatmul.mubr.msk.f32.vlgmr.msra.gmra.mrb[10].mxu0 %vm233_vm3, %v683_v32 }
 0x5b7   :  { %3136 = vmatpush3.bf16.msra.mxu0 %v3572_v5  ;;  %2901 = vmatprep.mubr.msk.f32.mxu0 %vm3475_vm0, %v3476_v1 }
 0x5b8   :  { %3137 = vmatprep.subr.bf16.mxu0 %v3474_v0 }
 0x5bb   :  { %3139 = vmatpush3.bf16.msra.mxu0 %v3589_v10 }
 0x5bc   :  { %3140 = vmatprep.subr.bf16.mxu0 %v3474_v0 }
 0x681   :  { %v848_v35 = vpop.f32.mrb[4].mxu1 }
 0x682   :  { %v852_v36 = vadd.f32 %v848_v35, %v196_v34  ;;  %v2870_v37 = vpop.f32.mrb[5].mxu1 }
 0x684   :  { %3294 = vtanh.f32 %v852_v36  ;;  %v2609_v50 = vmul.f32 -1.442695, %v852_v36 }
 0x689   :  { %v752_v39 = vpop.f32.mrb[10].mxu0 }
 0x68a   :  { %v3237_v40 = vadd.f32 %v3705_v60, %v752_v39  ;;  %v2859_v41 = vpop.f32.mrb[11].mxu0 }
 0x68c   :  { %3296 = vtanh.f32 %v3237_v40  ;;  %v2607_v52 = vmul.f32 -1.442695, %v3237_v40 }
 0x68d   :  { %3298 = vpow2.f32 %v2609_v50 }
 0x68e   :  { %v3295_v42 = vpop.eup %3294  ;;  %3300 = vpow2.f32 %v2607_v52 }
 0x68f   :  { %862 = vrot.lane.b32.xlu0 %v3295_v42, %s3477_s28 }
 0x696   :  { %v3297_v49 = vpop.eup %3296 }
 0x697   :  { %766 = vrot.lane.b32.xlu1 %v3297_v49, %s3477_s28  ;;  %v3299_v44 = vpop.eup %3298 }
 0x698   :  { %v856_v53 = vadd.f32 1.0, %v3299_v44  ;;  %v3301_v54 = vpop.eup %3300 }
 0x699   :  { %v760_v56 = vadd.f32 1.0, %v3301_v54 }
 0x69a   :  { %3302 = vrcp.f32 %v856_v53 }
 0x69b   :  { %3304 = vrcp.f32 %v760_v56 }
 0x6a4   :  { %v3303_v57 = vpop.eup %3302 }
 0x6a5   :  { %v3305_v61 = vpop.eup %3304  ;;  %v860_v2 = vmul.f32 %v3303_v57, %v3713_v21 }
 0x6a6   :  { %v764_v6 = vmul.f32 %v3305_v61, %v3716_v24 }
 0x701   :  { %v863_v58 = vpop.permute.xlu0 %862 }
 0x702   :  { %v865_v59 = vmul.f32 %v3303_v57, %v863_v58 }
 0x704   :  { %867 = vrot.lane.b32.xlu0 %v865_v59, %s3477_s28 }
 0x709   :  { %v767_v62 = vpop.permute.xlu1 %766 }
 0x70a   :  { %v769_v63 = vmul.f32 %v3305_v61, %v767_v62 }
 0x70c   :  { %771 = vrot.lane.b32.xlu1 %v769_v63, %s3477_s28  ;;  %v206_v63 = vadd.f32 %v3607_v12, %v3669_v46 }
 0x776   :  { %v868_v3 = vpop.permute.xlu0 %867 }
 0x777   :  { %v3752_v4 = vadd.f32 %v868_v3, %v860_v2 }
 0x779   :  { %3306 = vtanh.f32 %v3752_v4 }
 0x77e   :  { %v772_v7 = vpop.permute.xlu1 %771 }
 0x77f   :  { %v3756_v8 = vadd.f32 %v772_v7, %v764_v6 }
 0x781   :  { %3308 = vtanh.f32 %v3756_v8 }
 0x783   :  { %v3307_v9 = vpop.eup %3306 }
 0x784   :  { %873 = vrot.lane.b32.xlu0 %v3307_v9, %s3477_s28 }
 0x78b   :  { %v3309_v11 = vpop.eup %3308 }
 0x78c   :  { %777 = vrot.lane.b32.xlu1 %v3309_v11, %s3477_s28 }
 0x7f6   :  { %v874_v13 = vpop.permute.xlu0 %873 }
 0x7f7   :  { %v876_v14 = vmul.f32 %v3303_v57, %v874_v13 }
 0x7f9   :  { %878 = vrot.lane.b32.xlu0 %v876_v14, %s3478_s4 }
 0x7fe   :  { %v778_v15 = vpop.permute.xlu1 %777 }
 0x7ff   :  { %v780_v16 = vmul.f32 %v3305_v61, %v778_v15 }
 0x801   :  { %954 = vrot.lane.b32.xlu1 %v780_v16, %s3478_s4 }
 0x86b   :  { %v879_v17 = vpop.permute.xlu0 %878 }
 0x86c   :  { %2880 = vmatmul.mubr.msk.f32.vlgmr.msra.gmra.mrb[6].mxu1 %vm233_vm3, %v879_v17  ;;  %2902 = vmatmul.mubr.msk.f32.vlgmr.msra.gmra.mrb[12].mxu0 %vm233_vm3, %v879_v17 }
 0x86d   :  { %3130 = vmatpush3.bf16.msra.mxu1 %v3675_v51  ;;  %2890 = vmatprep.mubr.msk.f32.mxu1 %vm3475_vm0, %v3476_v1 }
 0x86e   :  { %3131 = vmatprep.subr.bf16.mxu1 %v3474_v0  ;;  %3142 = vmatpush3.bf16.msra.mxu0 %v3632_v33 }
 0x86f   :  { %3143 = vmatprep.subr.bf16.mxu0 %v3474_v0  ;;  %2912 = vmatprep.mubr.msk.f32.mxu0 %vm3475_vm0, %v3476_v1 }
 0x871   :  { %3133 = vmatpush3.bf16.msra.mxu1 %v3680_v55 }
 0x872   :  { %3152 = vmatprep.subr.bf16.mxu1 %v3474_v0  ;;  %3145 = vmatpush3.bf16.msra.mxu0 %v3648_v38 }
 0x873   :  { %v955_v18 = vpop.permute.xlu1 %954  ;;  %3146 = vmatprep.subr.bf16.mxu0 %v3474_v0 }
 0x874   :  { %2891 = vmatmul.mubr.msk.f32.vlgmr.msra.gmra.mrb[6].mxu1 %vm233_vm3, %v955_v18 }
 0x875   :  { %3154 = vmatpush3.bf16.msra.mxu1 %v3572_v5  ;;  %2934 = vmatprep.mubr.msk.f32.mxu1 %vm3475_vm0, %v3476_v1 }
 0x876   :  { %3155 = vmatprep.subr.bf16.mxu1 %v3474_v0 }
 0x879   :  { %3157 = vmatpush3.bf16.msra.mxu1 %v3589_v10 }
 0x87a   :  { %3158 = vmatprep.subr.bf16.mxu1 %v3474_v0 }
 0x93f   :  { %v1120_v20 = vpop.f32.mrb[12].mxu0 }
 0x940   :  { %v1124_v21 = vadd.f32 %v1120_v20, %v201_v19  ;;  %v2903_v22 = vpop.f32.mrb[13].mxu0 }
 0x942   :  { %3310 = vtanh.f32 %v1124_v21  ;;  %v2614_v29 = vmul.f32 -1.442695, %v1124_v21 }
 0x947   :  { %v1024_v23 = vpop.f32.mrb[6].mxu1 }
 0x948   :  { %v3238_v24 = vadd.f32 %v3705_v60, %v1024_v23  ;;  %v2892_v25 = vpop.f32.mrb[7].mxu1 }
 0x94a   :  { %3312 = vtanh.f32 %v3238_v24  ;;  %v2612_v27 = vmul.f32 -1.442695, %v3238_v24 }
 0x94b   :  { %3314 = vpow2.f32 %v2614_v29 }
 0x94c   :  { %v3311_v26 = vpop.eup %3310  ;;  %3316 = vpow2.f32 %v2612_v27 }
 0x94d   :  { %1134 = vrot.lane.b32.xlu0 %v3311_v26, %s3477_s28 }
 0x954   :  { %v3313_v28 = vpop.eup %3312 }
 0x955   :  { %1038 = vrot.lane.b32.xlu1 %v3313_v28, %s3477_s28  ;;  %v3315_v43 = vpop.eup %3314 }
 0x956   :  { %v1128_v30 = vadd.f32 1.0, %v3315_v43  ;;  %v3317_v31 = vpop.eup %3316 }
 0x957   :  { %v1032_v32 = vadd.f32 1.0, %v3317_v31 }
 0x958   :  { %3318 = vrcp.f32 %v1128_v30 }
 0x959   :  { %3320 = vrcp.f32 %v1032_v32 }
 0x962   :  { %v3319_v34 = vpop.eup %3318 }
 0x963   :  { %v3321_v37 = vpop.eup %3320  ;;  %v1132_v41 = vmul.f32 %v3319_v34, %v3752_v4 }
 0x964   :  { %v1036_v50 = vmul.f32 %v3321_v37, %v3756_v8 }
 0x9bf   :  { %v1135_v35 = vpop.permute.xlu0 %1134 }
 0x9c0   :  { %v1137_v36 = vmul.f32 %v3319_v34, %v1135_v35 }
 0x9c2   :  { %1139 = vrot.lane.b32.xlu0 %v1137_v36, %s3477_s28 }
 0x9c7   :  { %v1039_v39 = vpop.permute.xlu1 %1038 }
 0x9c8   :  { %v1041_v40 = vmul.f32 %v3321_v37, %v1039_v39  ;;  %v211_v39 = vadd.f32 %v3667_v45, %v3607_v12 }
 0x9ca   :  { %1043 = vrot.lane.b32.xlu1 %v1041_v40, %s3477_s28 }
 0xa34   :  { %v1140_v42 = vpop.permute.xlu0 %1139 }
 0xa35   :  { %v3792_v49 = vadd.f32 %v1140_v42, %v1132_v41 }
 0xa37   :  { %3322 = vtanh.f32 %v3792_v49 }
 0xa3c   :  { %v1044_v52 = vpop.permute.xlu1 %1043 }
 0xa3d   :  { %v3796_v44 = vadd.f32 %v1044_v52, %v1036_v50 }
 0xa3f   :  { %3324 = vtanh.f32 %v3796_v44 }
 0xa41   :  { %v3323_v53 = vpop.eup %3322 }
 0xa42   :  { %1145 = vrot.lane.b32.xlu0 %v3323_v53, %s3477_s28 }
 0xa49   :  { %v3325_v54 = vpop.eup %3324 }
 0xa4a   :  { %1049 = vrot.lane.b32.xlu1 %v3325_v54, %s3477_s28 }
 0xab4   :  { %v1146_v56 = vpop.permute.xlu0 %1145 }
 0xab5   :  { %v1148_v57 = vmul.f32 %v3319_v34, %v1146_v56 }
 0xab7   :  { %1150 = vrot.lane.b32.xlu0 %v1148_v57, %s3478_s4 }
 0xabc   :  { %v1050_v58 = vpop.permute.xlu1 %1049 }
 0xabd   :  { %v1052_v59 = vmul.f32 %v3321_v37, %v1050_v58 }
 0xabf   :  { %1226 = vrot.lane.b32.xlu1 %v1052_v59, %s3478_s4 }
 0xb29   :  { %v1151_v61 = vpop.permute.xlu0 %1150 }
 0xb2a   :  { %2913 = vmatmul.mubr.msk.f32.vlgmr.msra.gmra.mrb[14].mxu0 %vm233_vm3, %v1151_v61  ;;  %2935 = vmatmul.mubr.msk.f32.vlgmr.msra.gmra.mrb[8].mxu1 %vm233_vm3, %v1151_v61 }
 0xb2b   :  { %3148 = vmatpush3.bf16.msra.mxu0 %v3675_v51  ;;  %2923 = vmatprep.mubr.msk.f32.mxu0 %vm3475_vm0, %v3476_v1 }
 0xb2c   :  { %3149 = vmatprep.subr.bf16.mxu0 %v3474_v0  ;;  %3160 = vmatpush3.bf16.msra.mxu1 %v3632_v33 }
 0xb2d   :  { %3161 = vmatprep.subr.bf16.mxu1 %v3474_v0  ;;  %2945 = vmatprep.mubr.msk.f32.mxu1 %vm3475_vm0, %v3476_v1 }
 0xb2f   :  { %3151 = vmatpush3.bf16.msra.mxu0 %v3680_v55 }
 0xb30   :  { %3170 = vmatprep.subr.bf16.mxu0 %v3474_v0  ;;  %3163 = vmatpush3.bf16.msra.mxu1 %v3648_v38 }
 0xb31   :  { %v1227_v62 = vpop.permute.xlu1 %1226  ;;  %3164 = vmatprep.subr.bf16.mxu1 %v3474_v0 }
 0xb32   :  { %2924 = vmatmul.mubr.msk.f32.vlgmr.msra.gmra.mrb[14].mxu0 %vm233_vm3, %v1227_v62 }
 0xb33   :  { %3172 = vmatpush3.bf16.msra.mxu0 %v3572_v5  ;;  %2967 = vmatprep.mubr.msk.f32.mxu0 %vm3475_vm0, %v3476_v1 }
 0xb34   :  { %3173 = vmatprep.subr.bf16.mxu0 %v3474_v0 }
 0xb37   :  { %3175 = vmatpush3.bf16.msra.mxu0 %v3589_v10 }
 0xb38   :  { %3176 = vmatprep.subr.bf16.mxu0 %v3474_v0 }
 0xbfd   :  { %v1392_v2 = vpop.f32.mrb[8].mxu1 }
 0xbfe   :  { %v1396_v3 = vadd.f32 %v1392_v2, %v206_v63  ;;  %v2936_v4 = vpop.f32.mrb[9].mxu1 }
 0xc00   :  { %3326 = vtanh.f32 %v1396_v3  ;;  %v2619_v13 = vmul.f32 -1.442695, %v1396_v3 }
 0xc05   :  { %v1296_v6 = vpop.f32.mrb[14].mxu0 }
 0xc06   :  { %v3239_v7 = vadd.f32 %v3705_v60, %v1296_v6  ;;  %v2925_v8 = vpop.f32.mrb[15].mxu0 }
 0xc08   :  { %3328 = vtanh.f32 %v3239_v7  ;;  %v2617_v14 = vmul.f32 -1.442695, %v3239_v7 }
 0xc09   :  { %3330 = vpow2.f32 %v2619_v13 }
 0xc0a   :  { %v3327_v9 = vpop.eup %3326  ;;  %3332 = vpow2.f32 %v2617_v14 }
 0xc0b   :  { %1406 = vrot.lane.b32.xlu0 %v3327_v9, %s3477_s28 }
 0xc12   :  { %v3329_v11 = vpop.eup %3328 }
 0xc13   :  { %1310 = vrot.lane.b32.xlu1 %v3329_v11, %s3477_s28  ;;  %v3331_v46 = vpop.eup %3330 }
 0xc14   :  { %v1400_v15 = vadd.f32 1.0, %v3331_v46  ;;  %v3333_v16 = vpop.eup %3332 }
 0xc15   :  { %v1304_v17 = vadd.f32 1.0, %v3333_v16 }
 0xc16   :  { %3334 = vrcp.f32 %v1400_v15 }
 0xc17   :  { %3336 = vrcp.f32 %v1304_v17 }
 0xc20   :  { %v3335_v18 = vpop.eup %3334 }
 0xc21   :  { %v3337_v21 = vpop.eup %3336  ;;  %v1404_v24 = vmul.f32 %v3335_v18, %v3792_v49 }
 0xc22   :  { %v1308_v28 = vmul.f32 %v3337_v21, %v3796_v44 }
 0xc7d   :  { %v1407_v19 = vpop.permute.xlu0 %1406 }
 0xc7e   :  { %v1409_v20 = vmul.f32 %v3335_v18, %v1407_v19 }
 0xc80   :  { %1411 = vrot.lane.b32.xlu0 %v1409_v20, %s3477_s28 }
 0xc85   :  { %v1311_v22 = vpop.permute.xlu1 %1310 }
 0xc86   :  { %v1313_v23 = vmul.f32 %v3337_v21, %v1311_v22 }
 0xc88   :  { %1315 = vrot.lane.b32.xlu1 %v1313_v23, %s3477_s28 }
 0xcf2   :  { %v1412_v25 = vpop.permute.xlu0 %1411 }
 0xcf3   :  { %v3832_v26 = vadd.f32 %v1412_v25, %v1404_v24 }
 0xcf5   :  { %3338 = vtanh.f32 %v3832_v26 }
 0xcfa   :  { %v1316_v29 = vpop.permute.xlu1 %1315 }
 0xcfb   :  { %v3836_v27 = vadd.f32 %v1316_v29, %v1308_v28 }
 0xcfd   :  { %3340 = vtanh.f32 %v3836_v27 }
 0xcff   :  { %v3339_v43 = vpop.eup %3338 }
 0xd00   :  { %1417 = vrot.lane.b32.xlu0 %v3339_v43, %s3477_s28 }
 0xd07   :  { %v3341_v30 = vpop.eup %3340 }
 0xd08   :  { %1321 = vrot.lane.b32.xlu1 %v3341_v30, %s3477_s28 }
 0xd72   :  { %v1418_v31 = vpop.permute.xlu0 %1417 }
 0xd73   :  { %v1420_v32 = vmul.f32 %v3335_v18, %v1418_v31 }
 0xd75   :  { %1422 = vrot.lane.b32.xlu0 %v1420_v32, %s3478_s4 }
 0xd7a   :  { %v1322_v34 = vpop.permute.xlu1 %1321 }
 0xd7b   :  { %v1324_v35 = vmul.f32 %v3337_v21, %v1322_v34  ;;  %v216_v21 = vadd.f32 %v3607_v12, %v3673_v48 }
 0xd7d   :  { %1498 = vrot.lane.b32.xlu1 %v1324_v35, %s3478_s4 }
 0xde7   :  { %v1423_v36 = vpop.permute.xlu0 %1422 }
 0xde8   :  { %2946 = vmatmul.mubr.msk.f32.vlgmr.msra.gmra.mrb[10].mxu1 %vm233_vm3, %v1423_v36  ;;  %2968 = vmatmul.mubr.msk.f32.vlgmr.msra.gmra.mrb[16].mxu0 %vm233_vm3, %v1423_v36 }
 0xde9   :  { %3166 = vmatpush3.bf16.msra.mxu1 %v3675_v51  ;;  %2956 = vmatprep.mubr.msk.f32.mxu1 %vm3475_vm0, %v3476_v1 }
 0xdea   :  { %3167 = vmatprep.subr.bf16.mxu1 %v3474_v0  ;;  %3178 = vmatpush3.bf16.msra.mxu0 %v3632_v33 }
 0xdeb   :  { %3179 = vmatprep.subr.bf16.mxu0 %v3474_v0  ;;  %2978 = vmatprep.mubr.msk.f32.mxu0 %vm3475_vm0, %v3476_v1 }
 0xded   :  { %3169 = vmatpush3.bf16.msra.mxu1 %v3680_v55 }
 0xdee   :  { %3188 = vmatprep.subr.bf16.mxu1 %v3474_v0  ;;  %3181 = vmatpush3.bf16.msra.mxu0 %v3648_v38 }
 0xdef   :  { %v1499_v37 = vpop.permute.xlu1 %1498  ;;  %3182 = vmatprep.subr.bf16.mxu0 %v3474_v0 }
 0xdf0   :  { %2957 = vmatmul.mubr.msk.f32.vlgmr.msra.gmra.mrb[10].mxu1 %vm233_vm3, %v1499_v37 }
 0xdf1   :  { %3190 = vmatpush3.bf16.msra.mxu1 %v3572_v5  ;;  %3000 = vmatprep.mubr.msk.f32.mxu1 %vm3475_vm0, %v3476_v1 }
 0xdf2   :  { %3191 = vmatprep.subr.bf16.mxu1 %v3474_v0 }
 0xdf5   :  { %3193 = vmatpush3.bf16.msra.mxu1 %v3589_v10 }
 0xdf6   :  { %3194 = vmatprep.subr.bf16.mxu1 %v3474_v0 }
 0xebb   :  { %v1664_v40 = vpop.f32.mrb[16].mxu0 }
 0xebc   :  { %v1668_v41 = vadd.f32 %v1664_v40, %v211_v39  ;;  %v2969_v42 = vpop.f32.mrb[17].mxu0 }
 0xebe   :  { %3342 = vtanh.f32 %v1668_v41  ;;  %v2624_v54 = vmul.f32 -1.442695, %v1668_v41 }
 0xec3   :  { %v1568_v49 = vpop.f32.mrb[10].mxu1 }
 0xec4   :  { %v3240_v50 = vadd.f32 %v3705_v60, %v1568_v49  ;;  %v2958_v52 = vpop.f32.mrb[11].mxu1 }
 0xec6   :  { %3344 = vtanh.f32 %v3240_v50  ;;  %v2622_v56 = vmul.f32 -1.442695, %v3240_v50 }
 0xec7   :  { %3346 = vpow2.f32 %v2624_v54 }
 0xec8   :  { %v3343_v44 = vpop.eup %3342  ;;  %3348 = vpow2.f32 %v2622_v56 }
 0xec9   :  { %1678 = vrot.lane.b32.xlu0 %v3343_v44, %s3477_s28 }
 0xed0   :  { %v3345_v53 = vpop.eup %3344 }
 0xed1   :  { %1582 = vrot.lane.b32.xlu1 %v3345_v53, %s3477_s28  ;;  %v3347_v45 = vpop.eup %3346 }
 0xed2   :  { %v1672_v57 = vadd.f32 1.0, %v3347_v45  ;;  %v3349_v58 = vpop.eup %3348 }
 0xed3   :  { %v1576_v59 = vadd.f32 1.0, %v3349_v58 }
 0xed4   :  { %3350 = vrcp.f32 %v1672_v57 }
 0xed5   :  { %3352 = vrcp.f32 %v1576_v59 }
 0xede   :  { %v3351_v61 = vpop.eup %3350 }
 0xedf   :  { %v3353_v2 = vpop.eup %3352  ;;  %v1676_v6 = vmul.f32 %v3351_v61, %v3832_v26 }
 0xee0   :  { %v1580_v9 = vmul.f32 %v3353_v2, %v3836_v27 }
 0xf3b   :  { %v1679_v62 = vpop.permute.xlu0 %1678 }
 0xf3c   :  { %v1681_v63 = vmul.f32 %v3351_v61, %v1679_v62 }
 0xf3e   :  { %1683 = vrot.lane.b32.xlu0 %v1681_v63, %s3477_s28 }
 0xf43   :  { %v1583_v3 = vpop.permute.xlu1 %1582 }
 0xf44   :  { %v1585_v4 = vmul.f32 %v3353_v2, %v1583_v3 }
 0xf46   :  { %1587 = vrot.lane.b32.xlu1 %v1585_v4, %s3477_s28 }
 0xfb0   :  { %v1684_v7 = vpop.permute.xlu0 %1683 }
 0xfb1   :  { %v3872_v8 = vadd.f32 %v1684_v7, %v1676_v6 }
 0xfb3   :  { %3354 = vtanh.f32 %v3872_v8 }
 0xfb8   :  { %v1588_v11 = vpop.permute.xlu1 %1587 }
 0xfb9   :  { %v3876_v13 = vadd.f32 %v1588_v11, %v1580_v9 }
 0xfbb   :  { %3356 = vtanh.f32 %v3876_v13 }
 0xfbd   :  { %v3355_v14 = vpop.eup %3354 }
 0xfbe   :  { %1689 = vrot.lane.b32.xlu0 %v3355_v14, %s3477_s28 }
 0xfc5   :  { %v3357_v46 = vpop.eup %3356 }
 0xfc6   :  { %1593 = vrot.lane.b32.xlu1 %v3357_v46, %s3477_s28 }
0x1030   :  { %v1690_v15 = vpop.permute.xlu0 %1689 }
0x1031   :  { %v1692_v16 = vmul.f32 %v3351_v61, %v1690_v15 }
0x1033   :  { %1694 = vrot.lane.b32.xlu0 %v1692_v16, %s3478_s4 }
0x1038   :  { %v1594_v17 = vpop.permute.xlu1 %1593 }
0x1039   :  { %v1596_v18 = vmul.f32 %v3353_v2, %v1594_v17 }
0x103b   :  { %1770 = vrot.lane.b32.xlu1 %v1596_v18, %s3478_s4 }
0x10a5   :  { %v1695_v19 = vpop.permute.xlu0 %1694 }
0x10a6   :  { %2979 = vmatmul.mubr.msk.f32.vlgmr.msra.gmra.mrb[18].mxu0 %vm233_vm3, %v1695_v19  ;;  %3001 = vmatmul.mubr.msk.f32.vlgmr.msra.gmra.mrb[12].mxu1 %vm233_vm3, %v1695_v19 }
0x10a7   :  { %3184 = vmatpush3.bf16.msra.mxu0 %v3675_v51  ;;  %2989 = vmatprep.mubr.msk.f32.mxu0 %vm3475_vm0, %v3476_v1 }
0x10a8   :  { %3185 = vmatprep.subr.bf16.mxu0 %v3474_v0  ;;  %3196 = vmatpush3.bf16.msra.mxu1 %v3632_v33 }
0x10a9   :  { %3197 = vmatprep.subr.bf16.mxu1 %v3474_v0  ;;  %3011 = vmatprep.mubr.msk.f32.mxu1 %vm3475_vm0, %v3476_v1 }
0x10ab   :  { %3187 = vmatpush3.bf16.msra.mxu0 %v3680_v55 }
0x10ac   :  { %3206 = vmatprep.subr.bf16.mxu0 %v3474_v0  ;;  %3199 = vmatpush3.bf16.msra.mxu1 %v3648_v38 }
0x10ad   :  { %v1771_v20 = vpop.permute.xlu1 %1770  ;;  %3200 = vmatprep.subr.bf16.mxu1 %v3474_v0 }
0x10ae   :  { %2990 = vmatmul.mubr.msk.f32.vlgmr.msra.gmra.mrb[18].mxu0 %vm233_vm3, %v1771_v20 }
0x10af   :  { %3208 = vmatpush3.bf16.msra.mxu0 %v3572_v5  ;;  %3033 = vmatprep.mubr.msk.f32.mxu0 %vm3475_vm0, %v3476_v1 }
0x10b0   :  { %3209 = vmatprep.subr.bf16.mxu0 %v3474_v0 }
0x10b3   :  { %3211 = vmatpush3.bf16.msra.mxu0 %v3589_v10 }
0x10b4   :  { %3212 = vmatprep.subr.bf16.mxu0 %v3474_v0 }
0x1179   :  { %v1936_v22 = vpop.f32.mrb[12].mxu1 }
0x117a   :  { %v1940_v23 = vadd.f32 %v1936_v22, %v216_v21  ;;  %v3002_v24 = vpop.f32.mrb[13].mxu1 }
0x117b   :  { %v2413_v24 = vld [vmem:[#allocation6] sm:$0xff] }
0x117c   :  { %3358 = vtanh.f32 %v1940_v23  ;;  %v2629_v10 = vmul.f32 -1.442695, %v1940_v23 }
0x1181   :  { %v1840_v25 = vpop.f32.mrb[18].mxu0 }
0x1182   :  { %v3241_v26 = vadd.f32 %v3705_v60, %v1840_v25  ;;  %v2991_v5 = vpop.f32.mrb[19].mxu0  ;;  %v2414_v25 = vld [vmem:[#allocation6 + $0x8] sm:$0xff] }
0x1183   :  { %v3225_v5 = vpack.c.bf16 %v2414_v25, %v2413_v24 }
0x1184   :  { %3360 = vtanh.f32 %v3241_v26  ;;  %v2627_v27 = vmul.f32 -1.442695, %v3241_v26  ;;  %v2415_v26 = vld [vmem:[#allocation6 + $0x10] sm:$0xff] }
0x1185   :  { %3362 = vpow2.f32 %v2629_v10 }
0x1186   :  { %v3359_v28 = vpop.eup %3358  ;;  %3364 = vpow2.f32 %v2627_v27 }
0x1187   :  { %1950 = vrot.lane.b32.xlu0 %v3359_v28, %s3477_s28  ;;  %v2416_v28 = vld [vmem:[#allocation6 + $0x18] sm:$0xff] }
0x1188   :  { %v3228_v10 = vpack.c.bf16 %v2416_v28, %v2415_v26 }
0x118e   :  { %v3361_v29 = vpop.eup %3360 }
0x118f   :  { %1854 = vrot.lane.b32.xlu1 %v3361_v29, %s3477_s28  ;;  %v3363_v48 = vpop.eup %3362 }
0x1190   :  { %v1944_v43 = vadd.f32 1.0, %v3363_v48  ;;  %v3365_v30 = vpop.eup %3364 }
0x1191   :  { %v1848_v31 = vadd.f32 1.0, %v3365_v30 }
0x1192   :  { %3366 = vrcp.f32 %v1944_v43 }
0x1193   :  { %3368 = vrcp.f32 %v1848_v31 }
0x119c   :  { %v3367_v32 = vpop.eup %3366 }
0x119d   :  { %v3369_v36 = vpop.eup %3368  ;;  %v1948_v40 = vmul.f32 %v3367_v32, %v3872_v8 }
0x119e   :  { %v1852_v49 = vmul.f32 %v3369_v36, %v3876_v13 }
0x11f9   :  { %v1951_v34 = vpop.permute.xlu0 %1950 }
0x11fa   :  { %v1953_v35 = vmul.f32 %v3367_v32, %v1951_v34 }
0x11fc   :  { %1955 = vrot.lane.b32.xlu0 %v1953_v35, %s3477_s28 }
0x1201   :  { %v1855_v37 = vpop.permute.xlu1 %1854 }
0x1202   :  { %v1857_v39 = vmul.f32 %v3369_v36, %v1855_v37 }
0x1204   :  { %1859 = vrot.lane.b32.xlu1 %v1857_v39, %s3477_s28 }
0x126e   :  { %v1956_v41 = vpop.permute.xlu0 %1955 }
0x126f   :  { %v3912_v42 = vadd.f32 %v1956_v41, %v1948_v40 }
0x1271   :  { %3370 = vtanh.f32 %v3912_v42 }
0x1276   :  { %v1860_v50 = vpop.permute.xlu1 %1859 }
0x1277   :  { %v3916_v52 = vadd.f32 %v1860_v50, %v1852_v49 }
0x1279   :  { %3372 = vtanh.f32 %v3916_v52 }
0x127b   :  { %v3371_v44 = vpop.eup %3370 }
0x127c   :  { %1961 = vrot.lane.b32.xlu0 %v3371_v44, %s3477_s28 }
0x1283   :  { %v3373_v53 = vpop.eup %3372 }
0x1284   :  { %1865 = vrot.lane.b32.xlu1 %v3373_v53, %s3477_s28 }
0x12ee   :  { %v1962_v54 = vpop.permute.xlu0 %1961 }
0x12ef   :  { %v1964_v56 = vmul.f32 %v3367_v32, %v1962_v54 }
0x12f1   :  { %1966 = vrot.lane.b32.xlu0 %v1964_v56, %s3478_s4 }
0x12f6   :  { %v1866_v45 = vpop.permute.xlu1 %1865 }
0x12f7   :  { %v1868_v57 = vmul.f32 %v3369_v36, %v1866_v45 }
0x12f9   :  { %2042 = vrot.lane.b32.xlu1 %v1868_v57, %s3478_s4 }
0x1363   :  { %v1967_v58 = vpop.permute.xlu0 %1966 }
0x1364   :  { %3012 = vmatmul.mubr.msk.f32.vlgmr.msra.gmra.mrb[14].mxu1 %vm233_vm3, %v1967_v58  ;;  %3034 = vmatmul.mubr.msk.f32.vlgmr.msra.gmra.mrb[20].mxu0 %vm233_vm3, %v1967_v58 }
0x1365   :  { %3202 = vmatpush3.bf16.msra.mxu1 %v3675_v51  ;;  %3022 = vmatprep.mubr.msk.f32.mxu1 %vm3475_vm0, %v3476_v1 }
0x1366   :  { %3203 = vmatprep.subr.bf16.mxu1 %v3474_v0  ;;  %3214 = vmatpush3.bf16.msra.mxu0 %v3632_v33  ;;  %v221_v33 = vadd.f32 %v3671_v47, %v3607_v12 }
0x1367   :  { %3215 = vmatprep.subr.bf16.mxu0 %v3474_v0  ;;  %3044 = vmatprep.mubr.msk.f32.mxu0 %vm3475_vm0, %v3476_v1 }
0x1369   :  { %3205 = vmatpush3.bf16.msra.mxu1 %v3680_v55 }
0x136a   :  { %3224 = vmatprep.subr.bf16.mxu1 %v3474_v0  ;;  %3217 = vmatpush3.bf16.msra.mxu0 %v3648_v38 }
0x136b   :  { %v2043_v59 = vpop.permute.xlu1 %2042  ;;  %3218 = vmatprep.subr.bf16.mxu0 %v3474_v0 }
0x136c   :  { %3023 = vmatmul.mubr.msk.f32.vlgmr.msra.gmra.mrb[14].mxu1 %vm233_vm3, %v2043_v59 }
0x136d   :  { %3066 = vmatprep.mubr.msk.f32.mxu1 %vm3475_vm0, %v3476_v1  ;;  %3226 = vmatpush3.bf16.msra.mxu1 %v3225_v5 }
0x136e   :  { %3227 = vmatprep.subr.bf16.mxu1 %v3474_v0 }
0x1371   :  { %3229 = vmatpush3.bf16.msra.mxu1 %v3228_v10 }
0x1372   :  { %3230 = vmatprep.subr.bf16.mxu1 %v3474_v0 }
0x1437   :  { %v2208_v61 = vpop.f32.mrb[20].mxu0 }
0x1438   :  { %v2212_v62 = vadd.f32 %v2208_v61, %v221_v33  ;;  %v3035_v63 = vpop.f32.mrb[21].mxu0 }
0x143a   :  { %3374 = vtanh.f32 %v2212_v62  ;;  %v2634_v7 = vmul.f32 -1.442695, %v2212_v62 }
0x143f   :  { %v2112_v2 = vpop.f32.mrb[14].mxu1 }
0x1440   :  { %v3242_v3 = vadd.f32 %v3705_v60, %v2112_v2  ;;  %v3024_v4 = vpop.f32.mrb[15].mxu1 }
0x1442   :  { %3376 = vtanh.f32 %v3242_v3  ;;  %v2632_v8 = vmul.f32 -1.442695, %v3242_v3 }
0x1443   :  { %3378 = vpow2.f32 %v2634_v7 }
0x1444   :  { %v3375_v38 = vpop.eup %3374  ;;  %3380 = vpow2.f32 %v2632_v8 }
0x1445   :  { %2222 = vrot.lane.b32.xlu0 %v3375_v38, %s3477_s28 }
0x144c   :  { %v3377_v6 = vpop.eup %3376 }
0x144d   :  { %2126 = vrot.lane.b32.xlu1 %v3377_v6, %s3477_s28  ;;  %v3379_v12 = vpop.eup %3378 }
0x144e   :  { %v2216_v47 = vadd.f32 1.0, %v3379_v12  ;;  %v3381_v9 = vpop.eup %3380 }
0x144f   :  { %v2120_v11 = vadd.f32 1.0, %v3381_v9 }
0x1450   :  { %3382 = vrcp.f32 %v2216_v47 }
0x1451   :  { %3384 = vrcp.f32 %v2120_v11 }
0x145a   :  { %v3383_v13 = vpop.eup %3382 }
0x145b   :  { %v3385_v15 = vpop.eup %3384  ;;  %v2220_v18 = vmul.f32 %v3383_v13, %v3912_v42 }
0x145c   :  { %v2124_v21 = vmul.f32 %v3385_v15, %v3916_v52 }
0x14b7   :  { %v2223_v14 = vpop.permute.xlu0 %2222 }
0x14b8   :  { %v2225_v46 = vmul.f32 %v3383_v13, %v2223_v14 }
0x14ba   :  { %2227 = vrot.lane.b32.xlu0 %v2225_v46, %s3477_s28 }
0x14bf   :  { %v2127_v16 = vpop.permute.xlu1 %2126 }
0x14c0   :  { %v2129_v17 = vmul.f32 %v3385_v15, %v2127_v16 }
0x14c2   :  { %2131 = vrot.lane.b32.xlu1 %v2129_v17, %s3477_s28 }
0x152c   :  { %v2228_v19 = vpop.permute.xlu0 %2227 }
0x152d   :  { %v2230_v20 = vadd.f32 %v2228_v19, %v2220_v18 }
0x152f   :  { %3386 = vtanh.f32 %v2230_v20 }
0x1534   :  { %v2132_v22 = vpop.permute.xlu1 %2131 }
0x1535   :  { %v2134_v23 = vadd.f32 %v2132_v22, %v2124_v21 }
0x1537   :  { %3388 = vtanh.f32 %v2134_v23 }
0x1539   :  { %v3387_v29 = vpop.eup %3386 }
0x153a   :  { %2233 = vrot.lane.b32.xlu0 %v3387_v29, %s3477_s28 }
0x1541   :  { %v3389_v27 = vpop.eup %3388 }
0x1542   :  { %2137 = vrot.lane.b32.xlu1 %v3389_v27, %s3477_s28 }
0x15ac   :  { %v2234_v48 = vpop.permute.xlu0 %2233 }
0x15ad   :  { %v2236_v43 = vmul.f32 %v3383_v13, %v2234_v48 }
0x15af   :  { %2238 = vrot.lane.b32.xlu0 %v2236_v43, %s3478_s4 }
0x15b4   :  { %v2138_v30 = vpop.permute.xlu1 %2137 }
0x15b5   :  { %v2140_v31 = vmul.f32 %v3385_v15, %v2138_v30 }
0x15b7   :  { %2314 = vrot.lane.b32.xlu1 %v2140_v31, %s3478_s4 }
0x1621   :  { %v2239_v32 = vpop.permute.xlu0 %2238 }
0x1622   :  { %3045 = vmatmul.mubr.msk.f32.vlgmr.msra.gmra.mrb[22].mxu0 %vm233_vm3, %v2239_v32  ;;  %3067 = vmatmul.mubr.msk.f32.vlgmr.msra.gmra.mrb[16].mxu1 %vm233_vm3, %v2239_v32 }
0x1623   :  { %3220 = vmatpush3.bf16.msra.mxu0 %v3675_v51  ;;  %3055 = vmatprep.mubr.msk.f32.mxu0 %vm3475_vm0, %v3476_v1  ;;  %v2638_v51 = vld [vmem:[%s3998_s8] ss:$0 sm:$0xff]  ;;  %s3479_s8 = smov [#allocation8]  }
0x1624   :  { %3221 = vmatprep.subr.bf16.mxu0 %v3474_v0  ;;  %3232 = vmatpush3.bf16.msra.mxu1 %v3225_v5  ;;  %s2576_s27 = sshll.u32 %s3479_s8, 4  ;;  %s2577_s27 = int_to_ptr.vmem [resolvable:$true] %s2576_s27 }
0x1625   :  { %3233 = vmatprep.subr.bf16.mxu1 %v3474_v0  ;;  %3077 = vmatprep.mubr.msk.f32.mxu1 %vm3475_vm0, %v3476_v1  ;;  %s3442_s3 = scalar_lea.vmem %s2577_s27, 256  ;;  %p3447_p3 = scmp.lt.s32.totalorder %s2577_s27, %s2577_s27 }
0x1626   :  { %p3443_p2 = scmp.ne.s32.totalorder %s2577_s27, %s3442_s3  ;;  %p3448_p4 = scmp.lt.s32.totalorder %s3442_s3, %s3442_s3 }
0x1627   :  { %3223 = vmatpush3.bf16.msra.mxu0 %v3680_v55 }
0x1628   :  { %3235 = vmatpush3.bf16.msra.mxu1 %v3228_v10  ;;  %p3449_p5 = por %p3448_p4, %p3447_p3 }
0x1629   :  { %v2315_v34 = vpop.permute.xlu1 %2314 }
0x162a   :  { %3056 = vmatmul.mubr.msk.f32.vlgmr.msra.gmra.mrb[22].mxu0 %vm233_vm3, %v2315_v34  ;;  %p3450_p6 = pnand %p3449_p5, %p3443_p2 }
0x16f5   :  { %v2490_v35 = vpop.f32.mrb[16].mxu1 }
0x16f6   :  { %v2491_v36 = vadd.f32 %v2638_v51, %v2490_v35  ;;  %v3068_v37 = vpop.f32.mrb[17].mxu1 }
0x16f8   :  { %2494 = vst [vmem:[#allocation8] sm:$0xff] %v2491_v36 }
0x16fd   :  { %v2384_v39 = vpop.f32.mrb[22].mxu0 }
0x16fe   :  { %v3243_v0 = vadd.f32 %v3705_v60, %v2384_v39  ;;  %v3057_v40 = vpop.f32.mrb[23].mxu0 }
0x1700   :  { %3390 = vtanh.f32 %v3243_v0  ;;  %v2637_v55 = vmul.f32 -1.442695, %v3243_v0 }
0x1702   :  { %3392 = vpow2.f32 %v2637_v55 }
0x170a   :  { %v3391_v1 = vpop.eup %3390 }
0x170b   :  { %2398 = vrot.lane.b32.xlu0 %v3391_v1, %s3477_s28 }
0x170c   :  { %v3393_v41 = vpop.eup %3392 }
0x170d   :  { %v2392_v42 = vadd.f32 1.0, %v3393_v41 }
0x170f   :  { %3394 = vrcp.f32 %v2392_v42 }
0x1719   :  { %v3395_v49 = vpop.eup %3394 }
0x171a   :  { %v2396_v44 = vmul.f32 %v3395_v49, %v2134_v23 }
0x177d   :  { %v2399_v50 = vpop.permute.xlu0 %2398 }
0x177e   :  { %v2401_v52 = vmul.f32 %v3395_v49, %v2399_v50 }
0x1780   :  { %2403 = vrot.lane.b32.xlu1 %v2401_v52, %s3477_s28 }
0x17f2   :  { %v2404_v53 = vpop.permute.xlu1 %2403 }
0x17f3   :  { %v2406_v54 = vadd.f32 %v2404_v53, %v2396_v44 }
0x17f5   :  { %3396 = vtanh.f32 %v2406_v54 }
0x17ff   :  { %v3397_v60 = vpop.eup %3396 }
0x1800   :  { %2409 = vrot.lane.b32.xlu0 %v3397_v60, %s3477_s28 }
0x1872   :  { %v2410_v56 = vpop.permute.xlu0 %2409 }
0x1873   :  { %v2412_v45 = vmul.f32 %v3395_v49, %v2410_v56 }
0x1875   :  { %2496 = vrot.lane.b32.xlu1 %v2412_v45, %s3478_s4 }
0x18e7   :  { %v2497_v57 = vpop.permute.xlu1 %2496 }
0x18e8   :  { %3078 = vmatmul.mubr.msk.f32.vlgmr.msra.gmra.mrb[18].mxu1 %vm233_vm3, %v2497_v57 }
0x19bb   :  { %v2566_v58 = vpop.f32.mrb[18].mxu1 }
0x19bc   :  { %v2567_v59 = vadd.f32 %v2638_v51, %v2566_v58  ;;  %v3079_v33 = vpop.f32.mrb[19].mxu1 }
0x19be   :  { %2570 = vst [vmem:[#allocation8 + $0x8] sm:$0xff] %v2567_v59 }
0x19bf   :  { %3453 = shalt.err (!%p3450_p6)
}
0x19c0   :  { %s3454_s30 = scalar_lea.hbm %s3999_s9, 256 }
0x19c1   :  { %p3455_p7 = scmp.ne.s32.totalorder %s3999_s9, %s3454_s30  ;;  %p3458_p8 = scmp.lt.u32.totalorder %s3454_s30, %s3999_s9 }
0x19c3   :  { %p3460_p9 = pnand %p3458_p8, %p3455_p7 }
0x19c5   :  { %3463 = shalt.err (!%p3460_p9)
}
0x19c6   :  { %2582 = dma.vmem_to_hbm [thread:$0]  %s2577_s27, 256, %s3999_s9, [#allocation5], %s3471_s19, %s3471_s19, %s3472_s20  }
0x19c7   :  { %3468 = dma.done.wait [#allocation5], 256  }
0x19c8   :  { %3469 = vsyncadd [#allocation5], 4294967040 }
0x19c9   :  { %2586 = vsyncpa [#allocation4], 1 }
0x19ca   :  { %2587 = vsyncpa [#allocation7], 1 }
0x19cb   :  { %2588 = vsyncpa [#allocation5], 1 }

</bundles_post_ra>
